<compile_context>
chip_gen: v6e
topology: v6e:2x2x1
jax: 0.10.0
libtpu: 0.0.40
codegen_flags: <defaults>
</compile_context>

<pallas_src>
import functools

import jax
import jax.numpy as jnp
from jax.experimental import pallas as pl
from jax.experimental.pallas import tpu as pltpu


def _round_up(x, m):
    return (x + m - 1) // m * m


# ------------------------- Linear: y = x @ W + b --------------------------- #
def _linear_kernel(x_ref, w_ref, b_ref, o_ref):
    acc = jnp.dot(x_ref[...], w_ref[...], preferred_element_type=jnp.float32)
    o_ref[...] = (acc + b_ref[...]).astype(o_ref.dtype)


def linear_pallas(x2d, w, b, *, tm=512):
    """x2d: (M, K); w: (K, N); b: (N,) -> (M, N).

    Tiled over M (software-pipelined); weight and bias stay resident in VMEM.
    """
    M, K = x2d.shape
    Kw, N = w.shape
    assert K == Kw
    itemsize = x2d.dtype.itemsize

    # Budget-aware row tile: resident weight (possibly double-buffered by the
    # pipeline) + double-buffered input/output row tiles must fit the scoped
    # VMEM budget on all of v5e / v6e / v7x (v7x physical VMEM is only 64 MiB).
    # TODO(synk): pin the constant-index weight/bias blocks to a single buffer
    # (pipeline_mode=pl.Buffered(1)) and/or cast weights to bf16 for ViT-H
    # shapes; that halves the dominant resident allocation.
    budget = 40 * 1024 * 1024

    def footprint(t):
        return itemsize * (2 * K * N + 2 * N + 2 * t * K + 2 * t * N)

    while tm > 8 and footprint(tm) > budget:
        tm //= 2
    tm = max(8, min(tm, _round_up(M, 8)))
    M_pad = _round_up(M, tm)
    if M_pad != M:
        x2d = jnp.pad(x2d, ((0, M_pad - M), (0, 0)))

    out = pl.pallas_call(
        _linear_kernel,
        out_shape=jax.ShapeDtypeStruct((M_pad, N), x2d.dtype),
        grid_spec=pltpu.PrefetchScalarGridSpec(
            num_scalar_prefetch=0,
            grid=(M_pad // tm,),
            in_specs=[
                pl.BlockSpec((tm, K), lambda i: (i, 0)),   # streamed rows
                pl.BlockSpec((K, N), lambda i: (0, 0)),    # resident weight
                pl.BlockSpec((1, N), lambda i: (0, 0)),    # resident bias
            ],
            out_specs=pl.BlockSpec((tm, N), lambda i: (i, 0)),
        ),
        compiler_params=pltpu.CompilerParams(
            dimension_semantics=("parallel",),
            vmem_limit_bytes=48 * 1024 * 1024),
        cost_estimate=pl.CostEstimate(
            flops=2 * M_pad * K * N,
            transcendentals=0,
            bytes_accessed=itemsize * (M_pad * K + K * N + N + M_pad * N)),
    )(x2d, w, b.reshape(1, N))
    return out[:M] if M_pad != M else out


# --------------- Fused per-batch multi-head attention kernel --------------- #
def _attn_kernel(qkv_ref, *rest, scale, dim, num_heads, H, W, use_rel_pos):
    if use_rel_pos:
        rel_h_ref, rel_w_ref, o_ref = rest
    else:
        (o_ref,) = rest
    S = H * W
    hd = dim // num_heads

    if use_rel_pos:
        # One-hot expansion matrices shared by all heads (built once per step):
        #   eh[k_h, k] = 1  iff  k // W == k_h   (broadcast rel_h over k_w)
        #   ew[k_w, k] = 1  iff  k %  W == k_w   (broadcast rel_w over k_h)
        row_h = jax.lax.broadcasted_iota(jnp.int32, (H, S), 0)
        col_h = jax.lax.broadcasted_iota(jnp.int32, (H, S), 1)
        eh = ((col_h >= row_h * W) & (col_h < row_h * W + W)).astype(
            jnp.float32)                                        # (H, S)
        eye_w = (jax.lax.broadcasted_iota(jnp.int32, (W, W), 0) ==
                 jax.lax.broadcasted_iota(jnp.int32, (W, W), 1)).astype(
            jnp.float32)
        ew = jnp.concatenate([eye_w] * H, axis=1)               # (W, S)

    outs = []
    for h in range(num_heads):          # static unroll; num_heads is small
        q = qkv_ref[0, :, pl.ds(h * hd, hd)]                    # (S, hd)
        k = qkv_ref[0, :, pl.ds(dim + h * hd, hd)]              # (S, hd)
        v = qkv_ref[0, :, pl.ds(2 * dim + h * hd, hd)]          # (S, hd)

        # scores with the softmax scale folded into q (S*hd mults, not S*S)
        s = jnp.einsum("qd,kd->qk", q * scale, k,
                       preferred_element_type=jnp.float32)       # (S, S) f32
        if use_rel_pos:
            # decomposed rel-pos bias expanded + added in-kernel (no S x S
            # bias ever hits HBM)
            s = (s
                 + jnp.dot(rel_h_ref[0, h], eh,
                           preferred_element_type=jnp.float32)
                 + jnp.dot(rel_w_ref[0, h], ew,
                           preferred_element_type=jnp.float32))

        # numerically-stable softmax over keys (f32), reciprocal-multiply
        s = s - jnp.max(s, axis=-1, keepdims=True)
        p = jnp.exp(s)
        inv = pl.reciprocal(jnp.sum(p, axis=-1, keepdims=True), approx=False)
        p = p * inv

        outs.append(jnp.dot(p.astype(v.dtype), v,
                            preferred_element_type=jnp.float32)
                    .astype(o_ref.dtype))

    # single lane-dense (S, dim) store (heads concatenated head-major,
    # matching the PyTorch merge layout)
    o_ref[0] = jnp.concatenate(outs, axis=-1)


def attn_fused_pallas(qkv3, rel_h, rel_w, *, scale, dim, num_heads, H, W):
    """qkv3: (B, S, 3*dim); rel_h: (B, nH, S, H) or None; rel_w: (B, nH, S, W).

    Returns (B, S, dim) with heads merged head-major along the last dim.
    """
    B, S, _ = qkv3.shape
    hd = dim // num_heads
    use_rel_pos = rel_h is not None
    kernel = functools.partial(_attn_kernel, scale=scale, dim=dim,
                               num_heads=num_heads, H=H, W=W,
                               use_rel_pos=use_rel_pos)

    in_specs = [pl.BlockSpec((1, S, 3 * dim), lambda b: (b, 0, 0))]
    operands = [qkv3]
    if use_rel_pos:
        in_specs.append(
            pl.BlockSpec((1, num_heads, S, H), lambda b: (b, 0, 0, 0)))
        in_specs.append(
            pl.BlockSpec((1, num_heads, S, W), lambda b: (b, 0, 0, 0)))
        operands += [rel_h, rel_w]

    flops = 4 * B * num_heads * S * S * hd
    bytes_accessed = 4 * B * S * 4 * dim
    if use_rel_pos:
        flops += 2 * B * num_heads * S * S * (H + W)
        bytes_accessed += 4 * B * num_heads * S * (H + W)

    # TODO(synk): flash-style KV tiling is still needed before using this for
    # SAM global-attention blocks (S~4096): the f32 (S,S) scores per head would
    # exceed VMEM there.  SAM window attention (S <= ~196) fits comfortably.
    # TODO(synk): for layers with tiny B (global attention) add a second
    # "parallel" grid axis over head groups so both v7x TensorCores get work.
    return pl.pallas_call(
        kernel,
        out_shape=jax.ShapeDtypeStruct((B, S, dim), qkv3.dtype),
        grid_spec=pltpu.PrefetchScalarGridSpec(
            num_scalar_prefetch=0,
            grid=(B,),
            in_specs=in_specs,
            out_specs=pl.BlockSpec((1, S, dim), lambda b: (b, 0, 0)),
        ),
        compiler_params=pltpu.CompilerParams(
            dimension_semantics=("parallel",),
            vmem_limit_bytes=48 * 1024 * 1024),
        cost_estimate=pl.CostEstimate(
            flops=flops,
            transcendentals=B * num_heads * S * S,
            bytes_accessed=bytes_accessed),
    )(*operands)


# ------------------------ rel-pos helpers (layout) ------------------------- #
def get_rel_pos_jax(q_size, k_size, rel_pos):
    """JAX port of get_rel_pos for the q_size == k_size (no resize) case."""
    max_rel_dist = 2 * max(q_size, k_size) - 1
    # TODO(synk): F.interpolate linear-resize branch not implemented; only
    # needed when the stored table length != 2*size - 1.
    assert rel_pos.shape[0] == max_rel_dist, "rel_pos resize path not supported"
    q_coords = jnp.arange(q_size)[:, None] * max(k_size / q_size, 1.0)
    k_coords = jnp.arange(k_size)[None, :] * max(q_size / k_size, 1.0)
    rel = (q_coords - k_coords
           + (k_size - 1) * max(q_size / k_size, 1.0)).astype(jnp.int32)
    return rel_pos[rel]                              # (q_size, k_size, C)


# --------------------------- full Attention fwd ---------------------------- #
def attention_pallas(x, qkv_w, qkv_b, proj_w, proj_b, *, num_heads,
                     rel_pos_h=None, rel_pos_w=None, use_rel_pos=False):
    """x: (B, H, W, dim). Weights in (in, out) layout (== PyTorch weight.T)."""
    B, H, W, dim = x.shape
    S = H * W
    head_dim = dim // num_heads
    scale = head_dim ** -0.5

    # qkv projection (Pallas tiled matmul); no head split/merge transposes —
    # the attention kernel slices heads directly out of the (S, 3*dim) block.
    qkv = linear_pallas(x.reshape(B * S, dim), qkv_w, qkv_b)      # (B*S, 3*dim)
    qkv3 = qkv.reshape(B, S, 3 * dim)

    rel_h = rel_w = None
    if use_rel_pos:
        Rh = get_rel_pos_jax(H, H, rel_pos_h)                     # (H, H, hd)
        Rw = get_rel_pos_jax(W, W, rel_pos_w)                     # (W, W, hd)
        # Only the small decomposed terms are materialized (B*nH*S*(H+W)),
        # never the (B*nH, S, S) bias; q is the UNSCALED q as in the reference.
        q5 = qkv.reshape(B, H, W, 3, num_heads, head_dim)[:, :, :, 0]
        rel_h = jnp.einsum("bhwnc,hkc->bnhwk", q5, Rh).reshape(
            B, num_heads, S, H)
        rel_w = jnp.einsum("bhwnc,wkc->bnhwk", q5, Rw).reshape(
            B, num_heads, S, W)
        # TODO(synk): fold these two small einsums into the attention kernel as
        # well (needs in-kernel (S,hd)->(H,W,hd) reshapes / batched einsums).

    out = attn_fused_pallas(qkv3, rel_h, rel_w, scale=scale, dim=dim,
                            num_heads=num_heads, H=H, W=W)        # (B, S, dim)

    # output projection (Pallas tiled matmul)
    out = linear_pallas(out.reshape(B * S, dim), proj_w, proj_b)
    return out.reshape(B, H, W, dim)


attention_pallas_jit = jax.jit(
    attention_pallas, static_argnames=("num_heads", "use_rel_pos"))


# ------------------------------ pure-JAX ref -------------------------------- #
def attention_ref(x, qkv_w, qkv_b, proj_w, proj_b, *, num_heads,
                  rel_pos_h=None, rel_pos_w=None, use_rel_pos=False):
    B, H, W, dim = x.shape
    S = H * W
    head_dim = dim // num_heads
    scale = head_dim ** -0.5
    qkv = x.reshape(B, S, dim) @ qkv_w + qkv_b
    qkv = qkv.reshape(B, S, 3, num_heads, head_dim)
    qkv = jnp.transpose(qkv, (2, 0, 3, 1, 4)).reshape(
        3, B * num_heads, S, head_dim)
    q, k, v = qkv[0], qkv[1], qkv[2]
    attn = (q * scale) @ jnp.swapaxes(k, -2, -1)
    if use_rel_pos:
        Rh = get_rel_pos_jax(H, H, rel_pos_h)
        Rw = get_rel_pos_jax(W, W, rel_pos_w)
        r_q = q.reshape(B * num_heads, H, W, head_dim)
        rel_h = jnp.einsum("bhwc,hkc->bhwk", r_q, Rh)
        rel_w = jnp.einsum("bhwc,wkc->bhwk", r_q, Rw)
        attn = (attn.reshape(B * num_heads, H, W, H, W)
                + rel_h[:, :, :, :, None]
                + rel_w[:, :, :, None, :]).reshape(B * num_heads, S, S)
    attn = jax.nn.softmax(attn, axis=-1)
    out = (attn @ v).reshape(B, num_heads, H, W, head_dim)
    out = jnp.transpose(out, (0, 2, 3, 1, 4)).reshape(B, S, dim)
    out = out @ proj_w + proj_b
    return out.reshape(B, H, W, dim)


# ---------------------------------- main ------------------------------------ #
if __name__ == "__main__":
    B, H, W = 2, 8, 8
    dim, num_heads = 64, 4
    head_dim = dim // num_heads

    key = jax.random.PRNGKey(0)
    k0, k1, k2, k3, k4, k5, k6 = jax.random.split(key, 7)
    x = jax.random.normal(k0, (B, H, W, dim), jnp.float32)
    # (in, out) layout == PyTorch nn.Linear weight transposed.
    qkv_w = jax.random.normal(k1, (dim, 3 * dim), jnp.float32) * 0.05
    qkv_b = jax.random.normal(k2, (3 * dim,), jnp.float32) * 0.05
    proj_w = jax.random.normal(k3, (dim, dim), jnp.float32) * 0.05
    proj_b = jax.random.normal(k4, (dim,), jnp.float32) * 0.05
    rel_pos_h = jax.random.normal(k5, (2 * H - 1, head_dim), jnp.float32) * 0.05
    rel_pos_w = jax.random.normal(k6, (2 * W - 1, head_dim), jnp.float32) * 0.05

    for use_rel in (False, True):
        out = attention_pallas_jit(
            x, qkv_w, qkv_b, proj_w, proj_b, num_heads=num_heads,
            rel_pos_h=rel_pos_h, rel_pos_w=rel_pos_w, use_rel_pos=use_rel)
        out = jax.block_until_ready(out)
        ref = attention_ref(
            x, qkv_w, qkv_b, proj_w, proj_b, num_heads=num_heads,
            rel_pos_h=rel_pos_h, rel_pos_w=rel_pos_w, use_rel_pos=use_rel)
        assert out.shape == (B, H, W, dim), out.shape
        err = float(jnp.max(jnp.abs(out - ref)))
        assert jnp.allclose(out, ref, atol=2e-4, rtol=2e-3), (use_rel, err)

    print("KERNEL_OK")
</pallas_src>

<mosaic_0001>
module attributes {stable_mosaic.version = 11 : i64} {
  func.func @_linear_kernel(%arg0: i32, %arg1: memref<128x64xf32, #tpu.memory_space<vmem>>, %arg2: memref<64x64xf32, #tpu.memory_space<vmem>>, %arg3: memref<1x64xf32, #tpu.memory_space<vmem>>, %arg4: memref<128x64xf32, #tpu.memory_space<vmem>>) attributes {dimension_semantics = [#tpu.dimension_semantics<parallel>], iteration_bounds = array<i64: 1>, scalar_prefetch = 0 : i64, scratch_operands = 0 : i64, tpu.core_type = #tpu.core_type<tc>, window_params = [{transform_indices = @transform_0, window_bounds = array<i64: 128, 64>}, {pipeline_mode = #tpu.pipeline_mode<synchronous>, transform_indices = @transform_1, window_bounds = array<i64: 64, 64>}, {pipeline_mode = #tpu.pipeline_mode<synchronous>, transform_indices = @transform_2, window_bounds = array<i64: 1, 64>}, {transform_indices = @transform_3, window_bounds = array<i64: 128, 64>}]} {
    %c0 = arith.constant 0 : index
    %c0_0 = arith.constant 0 : index
    %0 = vector.load %arg1[%c0, %c0_0] : memref<128x64xf32, #tpu.memory_space<vmem>>, vector<128x64xf32>
    %c0_1 = arith.constant 0 : index
    %c0_2 = arith.constant 0 : index
    %1 = vector.load %arg2[%c0_1, %c0_2] : memref<64x64xf32, #tpu.memory_space<vmem>>, vector<64x64xf32>
    %cst = arith.constant dense<0.000000e+00> : vector<128x64xf32>
    %2 = tpu.matmul %0, %1, %cst {dimension_numbers = #tpu.dot_dimension_numbers<[1], [0], [0], [1], [0, 0, 1, 1], [], []>} : vector<128x64xf32>, vector<64x64xf32>, vector<128x64xf32> -> vector<128x64xf32>
    %c0_3 = arith.constant 0 : index
    %c0_4 = arith.constant 0 : index
    %3 = vector.load %arg3[%c0_3, %c0_4] : memref<1x64xf32, #tpu.memory_space<vmem>>, vector<1x64xf32>
    %4 = vector.broadcast %3 : vector<1x64xf32> to vector<128x64xf32>
    %5 = arith.addf %2, %4 : vector<128x64xf32>
    %c0_5 = arith.constant 0 : index
    %c0_6 = arith.constant 0 : index
    %6 = vector.load %arg4[%c0_5, %c0_6] : memref<128x64xf32, #tpu.memory_space<vmem>>, vector<128x64xf32>
    tpu.vector_store %arg4[%c0_5, %c0_6], %5 {strides = array<i32>} : memref<128x64xf32, #tpu.memory_space<vmem>>, vector<128x64xf32>,
    return
  }
  func.func @transform_0(%arg0: i32) -> (i32, i32) {
    %c0_i32 = arith.constant 0 : i32
    %c0_i32_0 = arith.constant 0 : i32
    return %arg0, %c0_i32 : i32, i32
  }
  func.func @transform_1(%arg0: i32) -> (i32, i32) {
    %c0_i32 = arith.constant 0 : i32
    %c0_i32_0 = arith.constant 0 : i32
    %c0_i32_1 = arith.constant 0 : i32
    return %c0_i32, %c0_i32_0 : i32, i32
  }
  func.func @transform_2(%arg0: i32) -> (i32, i32) {
    %c0_i32 = arith.constant 0 : i32
    %c0_i32_0 = arith.constant 0 : i32
    %c0_i32_1 = arith.constant 0 : i32
    return %c0_i32, %c0_i32_0 : i32, i32
  }
  func.func @transform_3(%arg0: i32) -> (i32, i32) {
    %c0_i32 = arith.constant 0 : i32
    %c0_i32_0 = arith.constant 0 : i32
    return %arg0, %c0_i32 : i32, i32
  }
}

module attributes {stable_mosaic.version = 11 : i64} {
  func.func @_linear_kernel(%arg0: i32, %arg1: memref<128x64xf32, #tpu.memory_space<vmem>>, %arg2: memref<64x192xf32, #tpu.memory_space<vmem>>, %arg3: memref<1x192xf32, #tpu.memory_space<vmem>>, %arg4: memref<128x192xf32, #tpu.memory_space<vmem>>) attributes {dimension_semantics = [#tpu.dimension_semantics<parallel>], iteration_bounds = array<i64: 1>, scalar_prefetch = 0 : i64, scratch_operands = 0 : i64, tpu.core_type = #tpu.core_type<tc>, window_params = [{transform_indices = @transform_0, window_bounds = array<i64: 128, 64>}, {pipeline_mode = #tpu.pipeline_mode<synchronous>, transform_indices = @transform_1, window_bounds = array<i64: 64, 192>}, {pipeline_mode = #tpu.pipeline_mode<synchronous>, transform_indices = @transform_2, window_bounds = array<i64: 1, 192>}, {transform_indices = @transform_3, window_bounds = array<i64: 128, 192>}]} {
    %c0 = arith.constant 0 : index
    %c0_0 = arith.constant 0 : index
    %0 = vector.load %arg1[%c0, %c0_0] : memref<128x64xf32, #tpu.memory_space<vmem>>, vector<128x64xf32>
    %c0_1 = arith.constant 0 : index
    %c0_2 = arith.constant 0 : index
    %1 = vector.load %arg2[%c0_1, %c0_2] : memref<64x192xf32, #tpu.memory_space<vmem>>, vector<64x192xf32>
    %cst = arith.constant dense<0.000000e+00> : vector<128x192xf32>
    %2 = tpu.matmul %0, %1, %cst {dimension_numbers = #tpu.dot_dimension_numbers<[1], [0], [0], [1], [0, 0, 1, 1], [], []>} : vector<128x64xf32>, vector<64x192xf32>, vector<128x192xf32> -> vector<128x192xf32>
    %c0_3 = arith.constant 0 : index
    %c0_4 = arith.constant 0 : index
    %3 = vector.load %arg3[%c0_3, %c0_4] : memref<1x192xf32, #tpu.memory_space<vmem>>, vector<1x192xf32>
    %4 = vector.broadcast %3 : vector<1x192xf32> to vector<128x192xf32>
    %5 = arith.addf %2, %4 : vector<128x192xf32>
    %c0_5 = arith.constant 0 : index
    %c0_6 = arith.constant 0 : index
    %6 = vector.load %arg4[%c0_5, %c0_6] : memref<128x192xf32, #tpu.memory_space<vmem>>, vector<128x192xf32>
    tpu.vector_store %arg4[%c0_5, %c0_6], %5 {strides = array<i32>} : memref<128x192xf32, #tpu.memory_space<vmem>>, vector<128x192xf32>,
    return
  }
  func.func @transform_0(%arg0: i32) -> (i32, i32) {
    %c0_i32 = arith.constant 0 : i32
    %c0_i32_0 = arith.constant 0 : i32
    return %arg0, %c0_i32 : i32, i32
  }
  func.func @transform_1(%arg0: i32) -> (i32, i32) {
    %c0_i32 = arith.constant 0 : i32
    %c0_i32_0 = arith.constant 0 : i32
    %c0_i32_1 = arith.constant 0 : i32
    return %c0_i32, %c0_i32_0 : i32, i32
  }
  func.func @transform_2(%arg0: i32) -> (i32, i32) {
    %c0_i32 = arith.constant 0 : i32
    %c0_i32_0 = arith.constant 0 : i32
    %c0_i32_1 = arith.constant 0 : i32
    return %c0_i32, %c0_i32_0 : i32, i32
  }
  func.func @transform_3(%arg0: i32) -> (i32, i32) {
    %c0_i32 = arith.constant 0 : i32
    %c0_i32_0 = arith.constant 0 : i32
    return %arg0, %c0_i32 : i32, i32
  }
}

module attributes {stable_mosaic.version = 11 : i64} {
  func.func @_attn_kernel(%arg0: i32, %arg1: memref<1x64x192xf32, #tpu.memory_space<vmem>>, %arg2: memref<1x64x64xf32, #tpu.memory_space<vmem>>) attributes {dimension_semantics = [#tpu.dimension_semantics<parallel>], iteration_bounds = array<i64: 2>, scalar_prefetch = 0 : i64, scratch_operands = 0 : i64, tpu.core_type = #tpu.core_type<tc>, window_params = [{transform_indices = @transform_0, window_bounds = array<i64: 1, 64, 192>}, {transform_indices = @transform_1, window_bounds = array<i64: 1, 64, 64>}]} {
    %c0 = arith.constant 0 : index
    %c0_0 = arith.constant 0 : index
    %c0_1 = arith.constant 0 : index
    %0 = vector.load %arg1[%c0, %c0_0, %c0_1] : memref<1x64x192xf32, #tpu.memory_space<vmem>>, vector<1x64x16xf32>
    %1 = vector.shape_cast %0 : vector<1x64x16xf32> to vector<64x16xf32>
    %c0_2 = arith.constant 0 : index
    %c0_3 = arith.constant 0 : index
    %c64 = arith.constant 64 : index
    %2 = vector.load %arg1[%c0_2, %c0_3, %c64] : memref<1x64x192xf32, #tpu.memory_space<vmem>>, vector<1x64x16xf32>
    %3 = vector.shape_cast %2 : vector<1x64x16xf32> to vector<64x16xf32>
    %c0_4 = arith.constant 0 : index
    %c0_5 = arith.constant 0 : index
    %c128 = arith.constant 128 : index
    %4 = vector.load %arg1[%c0_4, %c0_5, %c128] : memref<1x64x192xf32, #tpu.memory_space<vmem>>, vector<1x64x16xf32>
    %5 = vector.shape_cast %4 : vector<1x64x16xf32> to vector<64x16xf32>
    %cst = arith.constant 2.500000e-01 : f32
    %6 = vector.broadcast %cst : f32 to vector<64x16xf32>
    %7 = arith.mulf %1, %6 : vector<64x16xf32>
    "tpu.trace_start"() <{level = 10 : i32, message = "qd,kd->qk"}> : () -> ()
    %cst_6 = arith.constant dense<0.000000e+00> : vector<64x64xf32>
    %8 = tpu.matmul %7, %3, %cst_6 {dimension_numbers = #tpu.dot_dimension_numbers<[1], [1], [0], [0], [0, 0, 1, 0], [], []>} : vector<64x16xf32>, vector<64x16xf32>, vector<64x64xf32> -> vector<64x64xf32>
    "tpu.trace_stop"() : () -> ()
    %cst_7 = arith.constant dense<0xFF800000> : vector<64xf32>
    %9 = vector.multi_reduction <maximumf>, %8, %cst_7 [1] : vector<64x64xf32> to vector<64xf32>
    %10 = vector.shape_cast %9 : vector<64xf32> to vector<64x1xf32>
    %11 = vector.broadcast %10 : vector<64x1xf32> to vector<64x64xf32>
    %12 = arith.subf %8, %11 : vector<64x64xf32>
    %13 = math.exp %12 : vector<64x64xf32>
    %cst_8 = arith.constant dense<0.000000e+00> : vector<64xf32>
    %14 = vector.multi_reduction <add>, %13, %cst_8 [1] : vector<64x64xf32> to vector<64xf32>
    %15 = vector.shape_cast %14 : vector<64xf32> to vector<64x1xf32>
    %16 = tpu.reciprocal %15 : vector<64x1xf32> -> vector<64x1xf32>
    %17 = vector.broadcast %16 : vector<64x1xf32> to vector<64x64xf32>
    %18 = arith.mulf %13, %17 : vector<64x64xf32>
    %cst_9 = arith.constant dense<0.000000e+00> : vector<64x16xf32>
    %19 = tpu.matmul %18, %5, %cst_9 {dimension_numbers = #tpu.dot_dimension_numbers<[1], [0], [0], [1], [0, 0, 1, 1], [], []>} : vector<64x64xf32>, vector<64x16xf32>, vector<64x16xf32> -> vector<64x16xf32>
    %c0_10 = arith.constant 0 : index
    %c0_11 = arith.constant 0 : index
    %c16 = arith.constant 16 : index
    %20 = vector.load %arg1[%c0_10, %c0_11, %c16] : memref<1x64x192xf32, #tpu.memory_space<vmem>>, vector<1x64x16xf32>
    %21 = vector.shape_cast %20 : vector<1x64x16xf32> to vector<64x16xf32>
    %c0_12 = arith.constant 0 : index
    %c0_13 = arith.constant 0 : index
    %c80 = arith.constant 80 : index
    %22 = vector.load %arg1[%c0_12, %c0_13, %c80] : memref<1x64x192xf32, #tpu.memory_space<vmem>>, vector<1x64x16xf32>
    %23 = vector.shape_cast %22 : vector<1x64x16xf32> to vector<64x16xf32>
    %c0_14 = arith.constant 0 : index
    %c0_15 = arith.constant 0 : index
    %c144 = arith.constant 144 : index
    %24 = vector.load %arg1[%c0_14, %c0_15, %c144] : memref<1x64x192xf32, #tpu.memory_space<vmem>>, vector<1x64x16xf32>
    %25 = vector.shape_cast %24 : vector<1x64x16xf32> to vector<64x16xf32>
    %cst_16 = arith.constant 2.500000e-01 : f32
    %26 = vector.broadcast %cst_16 : f32 to vector<64x16xf32>
    %27 = arith.mulf %21, %26 : vector<64x16xf32>
    "tpu.trace_start"() <{level = 10 : i32, message = "qd,kd->qk"}> : () -> ()
    %cst_17 = arith.constant dense<0.000000e+00> : vector<64x64xf32>
    %28 = tpu.matmul %27, %23, %cst_17 {dimension_numbers = #tpu.dot_dimension_numbers<[1], [1], [0], [0], [0, 0, 1, 0], [], []>} : vector<64x16xf32>, vector<64x16xf32>, vector<64x64xf32> -> vector<64x64xf32>
    "tpu.trace_stop"() : () -> ()
    %cst_18 = arith.constant dense<0xFF800000> : vector<64xf32>
    %29 = vector.multi_reduction <maximumf>, %28, %cst_18 [1] : vector<64x64xf32> to vector<64xf32>
    %30 = vector.shape_cast %29 : vector<64xf32> to vector<64x1xf32>
    %31 = vector.broadcast %30 : vector<64x1xf32> to vector<64x64xf32>
    %32 = arith.subf %28, %31 : vector<64x64xf32>
    %33 = math.exp %32 : vector<64x64xf32>
    %cst_19 = arith.constant dense<0.000000e+00> : vector<64xf32>
    %34 = vector.multi_reduction <add>, %33, %cst_19 [1] : vector<64x64xf32> to vector<64xf32>
    %35 = vector.shape_cast %34 : vector<64xf32> to vector<64x1xf32>
    %36 = tpu.reciprocal %35 : vector<64x1xf32> -> vector<64x1xf32>
    %37 = vector.broadcast %36 : vector<64x1xf32> to vector<64x64xf32>
    %38 = arith.mulf %33, %37 : vector<64x64xf32>
    %cst_20 = arith.constant dense<0.000000e+00> : vector<64x16xf32>
    %39 = tpu.matmul %38, %25, %cst_20 {dimension_numbers = #tpu.dot_dimension_numbers<[1], [0], [0], [1], [0, 0, 1, 1], [], []>} : vector<64x64xf32>, vector<64x16xf32>, vector<64x16xf32> -> vector<64x16xf32>
    %c0_21 = arith.constant 0 : index
    %c0_22 = arith.constant 0 : index
    %c32 = arith.constant 32 : index
    %40 = vector.load %arg1[%c0_21, %c0_22, %c32] : memref<1x64x192xf32, #tpu.memory_space<vmem>>, vector<1x64x16xf32>
    %41 = vector.shape_cast %40 : vector<1x64x16xf32> to vector<64x16xf32>
    %c0_23 = arith.constant 0 : index
    %c0_24 = arith.constant 0 : index
    %c96 = arith.constant 96 : index
    %42 = vector.load %arg1[%c0_23, %c0_24, %c96] : memref<1x64x192xf32, #tpu.memory_space<vmem>>, vector<1x64x16xf32>
    %43 = vector.shape_cast %42 : vector<1x64x16xf32> to vector<64x16xf32>
    %c0_25 = arith.constant 0 : index
    %c0_26 = arith.constant 0 : index
    %c160 = arith.constant 160 : index
    %44 = vector.load %arg1[%c0_25, %c0_26, %c160] : memref<1x64x192xf32, #tpu.memory_space<vmem>>, vector<1x64x16xf32>
    %45 = vector.shape_cast %44 : vector<1x64x16xf32> to vector<64x16xf32>
    %cst_27 = arith.constant 2.500000e-01 : f32
    %46 = vector.broadcast %cst_27 : f32 to vector<64x16xf32>
    %47 = arith.mulf %41, %46 : vector<64x16xf32>
    "tpu.trace_start"() <{level = 10 : i32, message = "qd,kd->qk"}> : () -> ()
    %cst_28 = arith.constant dense<0.000000e+00> : vector<64x64xf32>
    %48 = tpu.matmul %47, %43, %cst_28 {dimension_numbers = #tpu.dot_dimension_numbers<[1], [1], [0], [0], [0, 0, 1, 0], [], []>} : vector<64x16xf32>, vector<64x16xf32>, vector<64x64xf32> -> vector<64x64xf32>
    "tpu.trace_stop"() : () -> ()
    %cst_29 = arith.constant dense<0xFF800000> : vector<64xf32>
    %49 = vector.multi_reduction <maximumf>, %48, %cst_29 [1] : vector<64x64xf32> to vector<64xf32>
    %50 = vector.shape_cast %49 : vector<64xf32> to vector<64x1xf32>
    %51 = vector.broadcast %50 : vector<64x1xf32> to vector<64x64xf32>
    %52 = arith.subf %48, %51 : vector<64x64xf32>
    %53 = math.exp %52 : vector<64x64xf32>
    %cst_30 = arith.constant dense<0.000000e+00> : vector<64xf32>
    %54 = vector.multi_reduction <add>, %53, %cst_30 [1] : vector<64x64xf32> to vector<64xf32>
    %55 = vector.shape_cast %54 : vector<64xf32> to vector<64x1xf32>
    %56 = tpu.reciprocal %55 : vector<64x1xf32> -> vector<64x1xf32>
    %57 = vector.broadcast %56 : vector<64x1xf32> to vector<64x64xf32>
    %58 = arith.mulf %53, %57 : vector<64x64xf32>
    %cst_31 = arith.constant dense<0.000000e+00> : vector<64x16xf32>
    %59 = tpu.matmul %58, %45, %cst_31 {dimension_numbers = #tpu.dot_dimension_numbers<[1], [0], [0], [1], [0, 0, 1, 1], [], []>} : vector<64x64xf32>, vector<64x16xf32>, vector<64x16xf32> -> vector<64x16xf32>
    %c0_32 = arith.constant 0 : index
    %c0_33 = arith.constant 0 : index
    %c48 = arith.constant 48 : index
    %60 = vector.load %arg1[%c0_32, %c0_33, %c48] : memref<1x64x192xf32, #tpu.memory_space<vmem>>, vector<1x64x16xf32>
    %61 = vector.shape_cast %60 : vector<1x64x16xf32> to vector<64x16xf32>
    %c0_34 = arith.constant 0 : index
    %c0_35 = arith.constant 0 : index
    %c112 = arith.constant 112 : index
    %62 = vector.load %arg1[%c0_34, %c0_35, %c112] : memref<1x64x192xf32, #tpu.memory_space<vmem>>, vector<1x64x16xf32>
    %63 = vector.shape_cast %62 : vector<1x64x16xf32> to vector<64x16xf32>
    %c0_36 = arith.constant 0 : index
    %c0_37 = arith.constant 0 : index
    %c176 = arith.constant 176 : index
    %64 = vector.load %arg1[%c0_36, %c0_37, %c176] : memref<1x64x192xf32, #tpu.memory_space<vmem>>, vector<1x64x16xf32>
    %65 = vector.shape_cast %64 : vector<1x64x16xf32> to vector<64x16xf32>
    %cst_38 = arith.constant 2.500000e-01 : f32
    %66 = vector.broadcast %cst_38 : f32 to vector<64x16xf32>
    %67 = arith.mulf %61, %66 : vector<64x16xf32>
    "tpu.trace_start"() <{level = 10 : i32, message = "qd,kd->qk"}> : () -> ()
    %cst_39 = arith.constant dense<0.000000e+00> : vector<64x64xf32>
    %68 = tpu.matmul %67, %63, %cst_39 {dimension_numbers = #tpu.dot_dimension_numbers<[1], [1], [0], [0], [0, 0, 1, 0], [], []>} : vector<64x16xf32>, vector<64x16xf32>, vector<64x64xf32> -> vector<64x64xf32>
    "tpu.trace_stop"() : () -> ()
    %cst_40 = arith.constant dense<0xFF800000> : vector<64xf32>
    %69 = vector.multi_reduction <maximumf>, %68, %cst_40 [1] : vector<64x64xf32> to vector<64xf32>
    %70 = vector.shape_cast %69 : vector<64xf32> to vector<64x1xf32>
    %71 = vector.broadcast %70 : vector<64x1xf32> to vector<64x64xf32>
    %72 = arith.subf %68, %71 : vector<64x64xf32>
    %73 = math.exp %72 : vector<64x64xf32>
    %cst_41 = arith.constant dense<0.000000e+00> : vector<64xf32>
    %74 = vector.multi_reduction <add>, %73, %cst_41 [1] : vector<64x64xf32> to vector<64xf32>
    %75 = vector.shape_cast %74 : vector<64xf32> to vector<64x1xf32>
    %76 = tpu.reciprocal %75 : vector<64x1xf32> -> vector<64x1xf32>
    %77 = vector.broadcast %76 : vector<64x1xf32> to vector<64x64xf32>
    %78 = arith.mulf %73, %77 : vector<64x64xf32>
    %cst_42 = arith.constant dense<0.000000e+00> : vector<64x16xf32>
    %79 = tpu.matmul %78, %65, %cst_42 {dimension_numbers = #tpu.dot_dimension_numbers<[1], [0], [0], [1], [0, 0, 1, 1], [], []>} : vector<64x64xf32>, vector<64x16xf32>, vector<64x16xf32> -> vector<64x16xf32>
    %80 = tpu.concatenate %19, %39, %59, %79 in 1 : vector<64x16xf32>, vector<64x16xf32>, vector<64x16xf32>, vector<64x16xf32> -> vector<64x64xf32>
    %c0_43 = arith.constant 0 : index
    %c0_44 = arith.constant 0 : index
    %c0_45 = arith.constant 0 : index
    %81 = vector.load %arg2[%c0_43, %c0_44, %c0_45] : memref<1x64x64xf32, #tpu.memory_space<vmem>>, vector<1x64x64xf32>
    %82 = vector.shape_cast %81 : vector<1x64x64xf32> to vector<64x64xf32>
    %83 = vector.shape_cast %80 : vector<64x64xf32> to vector<1x64x64xf32>
    tpu.vector_store %arg2[%c0_43, %c0_44, %c0_45], %83 {strides = array<i32>} : memref<1x64x64xf32, #tpu.memory_space<vmem>>, vector<1x64x64xf32>,
    return
  }
  func.func @transform_0(%arg0: i32) -> (i32, i32, i32) {
    %c0_i32 = arith.constant 0 : i32
    %c0_i32_0 = arith.constant 0 : i32
    %c0_i32_1 = arith.constant 0 : i32
    return %arg0, %c0_i32, %c0_i32_0 : i32, i32, i32
  }
  func.func @transform_1(%arg0: i32) -> (i32, i32, i32) {
    %c0_i32 = arith.constant 0 : i32
    %c0_i32_0 = arith.constant 0 : i32
    %c0_i32_1 = arith.constant 0 : i32
    return %arg0, %c0_i32, %c0_i32_0 : i32, i32, i32
  }
}

</mosaic_0001>

<bundles_post_ra>
// kernel: attention_pallas.5
= control target key start
LH: loop header
LB: loop body
LE: loop exit
PB: predicated region body
PF: predicated region fallthrough
CT: control target
= control target key end

     0   :  { %s527_s0 = inlined_call_operand.vmem [shape: f32[128,64], index: 0, kind: input, shape index: {}]   ;;  %s528_s1 = inlined_call_operand.vmem [shape: f32[64,64], index: 1, kind: input, shape index: {}]   ;;  %s529_s2 = inlined_call_operand.vmem [shape: f32[1,64], index: 2, kind: input, shape index: {}]   ;;  %s530_s3 = inlined_call_operand.hbm [shape: f32[128,64], index: 3, kind: output, shape index: {}]  }
   0x1   :  { %v38_v0 = vld [vmem:[%s528_s1 + $0x38] sm:$0xff]  ;;  %v37_v1 = vld [vmem:[%s528_s1 + $0x30] sm:$0xff]  ;;  %v36_v2 = vld [vmem:[%s528_s1 + $0x28] sm:$0xff] }
   0x2   :  { %313 = vmatprep.subr.mxu0 %v38_v0  ;;  %353 = vmatprep.subr.mxu1 %v38_v0  ;;  %v35_v3 = vld [vmem:[%s528_s1 + $0x20] sm:$0xff]  ;;  %v34_v4 = vld [vmem:[%s528_s1 + $0x18] sm:$0xff]  ;;  %v33_v5 = vld [vmem:[%s528_s1 + $0x10] sm:$0xff] }
   0x3   :  { %314 = vmatpush3.msra.mxu0 %v38_v0  ;;  %361 = vmatpush3.msra.mxu1 %v38_v0 }
   0x4   :  { %315 = vmatprep.subr.mxu0 %v37_v1  ;;  %354 = vmatprep.subr.mxu1 %v37_v1 }
   0x5   :  { %316 = vmatpush3.msra.mxu0 %v37_v1  ;;  %362 = vmatpush3.msra.mxu1 %v37_v1 }
   0x6   :  { %317 = vmatprep.subr.mxu0 %v36_v2  ;;  %355 = vmatprep.subr.mxu1 %v36_v2 }
   0x7   :  { %318 = vmatpush3.msra.mxu0 %v36_v2  ;;  %363 = vmatpush3.msra.mxu1 %v36_v2 }
   0x8   :  { %319 = vmatprep.subr.mxu0 %v35_v3  ;;  %356 = vmatprep.subr.mxu1 %v35_v3 }
   0x9   :  { %320 = vmatpush3.msra.mxu0 %v35_v3  ;;  %364 = vmatpush3.msra.mxu1 %v35_v3 }
   0xa   :  { %8 = vsyncpa [#allocation3], 0  ;;  %321 = vmatprep.subr.mxu0 %v34_v4  ;;  %357 = vmatprep.subr.mxu1 %v34_v4  ;;  %v32_v6 = vld [vmem:[%s528_s1 + $0x8] sm:$0xff]  ;;  %v31_v7 = vld [vmem:[%s528_s1] sm:$0xff]  ;;  %vm46_vm0 = vcmask 523264  }
   0xb   :  { %322 = vmatpush3.msra.mxu0 %v34_v4  ;;  %365 = vmatpush3.msra.mxu1 %v34_v4  ;;  %v15_v8 = vld [vmem:[%s527_s0] sm:$0xff]  ;;  %v16_v10 = vld [vmem:[%s527_s0 + $0x8] sm:$0xff]  ;;  %v17_v12 = vld [vmem:[%s527_s0 + $0x10] sm:$0xff] }
   0xc   :  { %323 = vmatprep.subr.mxu0 %v33_v5  ;;  %358 = vmatprep.subr.mxu1 %v33_v5  ;;  %v23_v9 = vld [vmem:[%s527_s0 + $0x40] sm:$0xff]  ;;  %v24_v11 = vld [vmem:[%s527_s0 + $0x48] sm:$0xff]  ;;  %v25_v13 = vld [vmem:[%s527_s0 + $0x50] sm:$0xff] }
   0xd   :  { %324 = vmatpush3.msra.mxu0 %v33_v5  ;;  %366 = vmatpush3.msra.mxu1 %v33_v5  ;;  %v18_v14 = vld [vmem:[%s527_s0 + $0x18] sm:$0xff]  ;;  %v19_v16 = vld [vmem:[%s527_s0 + $0x20] sm:$0xff]  ;;  %v20_v18 = vld [vmem:[%s527_s0 + $0x28] sm:$0xff] }
   0xe   :  { %325 = vmatprep.subr.mxu0 %v32_v6  ;;  %359 = vmatprep.subr.mxu1 %v32_v6  ;;  %v26_v15 = vld [vmem:[%s527_s0 + $0x58] sm:$0xff]  ;;  %v27_v17 = vld [vmem:[%s527_s0 + $0x60] sm:$0xff]  ;;  %v28_v19 = vld [vmem:[%s527_s0 + $0x68] sm:$0xff] }
   0xf   :  { %326 = vmatpush3.msra.mxu0 %v32_v6  ;;  %367 = vmatpush3.msra.mxu1 %v32_v6  ;;  %v21_v20 = vld [vmem:[%s527_s0 + $0x30] sm:$0xff]  ;;  %v22_v22 = vld [vmem:[%s527_s0 + $0x38] sm:$0xff]  ;;  %v272_v24 = vld [vmem:[%s529_s2] ss:$0 sm:$0xff] }
  0x10   :  { %327 = vmatprep.subr.mxu0 %v31_v7  ;;  %360 = vmatprep.subr.mxu1 %v31_v7  ;;  %v29_v21 = vld [vmem:[%s527_s0 + $0x70] sm:$0xff]  ;;  %v30_v23 = vld [vmem:[%s527_s0 + $0x78] sm:$0xff]  ;;  %s394_s0 = smov [#allocation2]  }
  0x11   :  { %328 = vmatpush3.msra.mxu0 %v31_v7  ;;  %368 = vmatpush3.msra.mxu1 %v31_v7  ;;  %s261_s2 = sshll.u32 %s394_s0, 4  ;;  %s262_s2 = int_to_ptr.vmem [resolvable:$true] %s261_s2 }
  0x12   :  { %329 = vmatprep.mubr.msk.f32.mxu0 %vm46_vm0, %v15_v8  ;;  %341 = vmatprep.mubr.msk.f32.mxu1 %vm46_vm0, %v23_v9  ;;  %s372_s1 = scalar_lea.vmem %s262_s2, 2048  ;;  %p377_p1 = scmp.lt.s32.totalorder %s262_s2, %s262_s2 }
  0x13   :  { %330 = vmatmul.mubr.msk.f32.vlgmr.msra.gmra.mxu0 %vm46_vm0, %v16_v10  ;;  %342 = vmatmul.mubr.msk.f32.vlgmr.msra.gmra.mxu1 %vm46_vm0, %v24_v11  ;;  %p373_p0 = scmp.ne.s32.totalorder %s262_s2, %s372_s1  ;;  %p378_p2 = scmp.lt.s32.totalorder %s372_s1, %s372_s1 }
  0x14   :  { %332 = vmatprep.mubr.msk.f32.mxu0 %vm46_vm0, %v17_v12  ;;  %344 = vmatprep.mubr.msk.f32.mxu1 %vm46_vm0, %v25_v13 }
  0x15   :  { %p379_p3 = por %p378_p2, %p377_p1 }
  0x17   :  { %333 = vmatmul.mubr.msk.f32.gmra.mxu0 %vm46_vm0, %v18_v14  ;;  %345 = vmatmul.mubr.msk.f32.gmra.mxu1 %vm46_vm0, %v26_v15  ;;  %p380_p4 = pnand %p379_p3, %p373_p0 }
  0x18   :  { %335 = vmatprep.mubr.msk.f32.mxu0 %vm46_vm0, %v19_v16  ;;  %347 = vmatprep.mubr.msk.f32.mxu1 %vm46_vm0, %v27_v17 }
  0x1b   :  { %336 = vmatmul.mubr.msk.f32.gmra.mxu0 %vm46_vm0, %v20_v18  ;;  %348 = vmatmul.mubr.msk.f32.gmra.mxu1 %vm46_vm0, %v28_v19 }
  0x1c   :  { %338 = vmatprep.mubr.msk.f32.mxu0 %vm46_vm0, %v21_v20  ;;  %350 = vmatprep.mubr.msk.f32.mxu1 %vm46_vm0, %v29_v21 }
  0x1f   :  { %339 = vmatmul.mubr.msk.f32.gmra.mxu0 %vm46_vm0, %v22_v22  ;;  %351 = vmatmul.mubr.msk.f32.gmra.mxu1 %vm46_vm0, %v30_v23 }
  0xd3   :  { %v331_v25 = vpop.f32.mrf.mxu0  ;;  %v343_v26 = vpop.f32.mrf.mxu1 }
  0xd4   :  { %v167_v27 = vadd.f32 %v331_v25, %v272_v24  ;;  %v207_v28 = vadd.f32 %v343_v26, %v272_v24 }
  0xd5   :  { %v161_v29 = vpop.f32.mrf.mxu0  ;;  %v201_v30 = vpop.f32.mrf.mxu1 }
  0xd6   :  { %241 = vst.msk [vmem:[#allocation2 + $0x8] sm:$0xff] %vm46_vm0, %v167_v27  ;;  %249 = vst.msk [vmem:[#allocation2 + $0x48] sm:$0xff] %vm46_vm0, %v207_v28  ;;  %v162_v31 = vadd.f32 %v272_v24, %v161_v29  ;;  %v202_v32 = vadd.f32 %v272_v24, %v201_v30 }
  0xd7   :  { %v334_v33 = vpop.f32.mrf.mxu0  ;;  %v346_v34 = vpop.f32.mrf.mxu1 }
  0xd8   :  { %240 = vst.msk [vmem:[#allocation2] sm:$0xff] %vm46_vm0, %v162_v31  ;;  %248 = vst.msk [vmem:[#allocation2 + $0x40] sm:$0xff] %vm46_vm0, %v202_v32  ;;  %v177_v35 = vadd.f32 %v334_v33, %v272_v24  ;;  %v217_v36 = vadd.f32 %v346_v34, %v272_v24 }
  0xd9   :  { %v171_v37 = vpop.f32.mrf.mxu0  ;;  %v211_v38 = vpop.f32.mrf.mxu1 }
  0xda   :  { %243 = vst.msk [vmem:[#allocation2 + $0x18] sm:$0xff] %vm46_vm0, %v177_v35  ;;  %251 = vst.msk [vmem:[#allocation2 + $0x58] sm:$0xff] %vm46_vm0, %v217_v36  ;;  %v172_v39 = vadd.f32 %v272_v24, %v171_v37  ;;  %v212_v40 = vadd.f32 %v272_v24, %v211_v38 }
  0xdb   :  { %v337_v41 = vpop.f32.mrf.mxu0  ;;  %v349_v42 = vpop.f32.mrf.mxu1 }
  0xdc   :  { %242 = vst.msk [vmem:[#allocation2 + $0x10] sm:$0xff] %vm46_vm0, %v172_v39  ;;  %250 = vst.msk [vmem:[#allocation2 + $0x50] sm:$0xff] %vm46_vm0, %v212_v40  ;;  %v187_v43 = vadd.f32 %v337_v41, %v272_v24  ;;  %v227_v44 = vadd.f32 %v349_v42, %v272_v24 }
  0xdd   :  { %v181_v45 = vpop.f32.mrf.mxu0  ;;  %v221_v46 = vpop.f32.mrf.mxu1 }
  0xde   :  { %245 = vst.msk [vmem:[#allocation2 + $0x28] sm:$0xff] %vm46_vm0, %v187_v43  ;;  %253 = vst.msk [vmem:[#allocation2 + $0x68] sm:$0xff] %vm46_vm0, %v227_v44  ;;  %v182_v47 = vadd.f32 %v272_v24, %v181_v45  ;;  %v222_v48 = vadd.f32 %v272_v24, %v221_v46 }
  0xdf   :  { %v340_v49 = vpop.f32.mrf.mxu0  ;;  %v352_v50 = vpop.f32.mrf.mxu1 }
  0xe0   :  { %244 = vst.msk [vmem:[#allocation2 + $0x20] sm:$0xff] %vm46_vm0, %v182_v47  ;;  %252 = vst.msk [vmem:[#allocation2 + $0x60] sm:$0xff] %vm46_vm0, %v222_v48  ;;  %v197_v51 = vadd.f32 %v340_v49, %v272_v24  ;;  %v237_v52 = vadd.f32 %v352_v50, %v272_v24 }
  0xe1   :  { %v191_v53 = vpop.f32.mrf.mxu0  ;;  %v231_v54 = vpop.f32.mrf.mxu1 }
  0xe2   :  { %247 = vst.msk [vmem:[#allocation2 + $0x38] sm:$0xff] %vm46_vm0, %v197_v51  ;;  %255 = vst.msk [vmem:[#allocation2 + $0x78] sm:$0xff] %vm46_vm0, %v237_v52  ;;  %v192_v55 = vadd.f32 %v272_v24, %v191_v53  ;;  %v232_v56 = vadd.f32 %v272_v24, %v231_v54 }
  0xe4   :  { %246 = vst.msk [vmem:[#allocation2 + $0x30] sm:$0xff] %vm46_vm0, %v192_v55  ;;  %254 = vst.msk [vmem:[#allocation2 + $0x70] sm:$0xff] %vm46_vm0, %v232_v56 }
  0xe5   :  { %383 = shalt.err (!%p380_p4)
}
  0xe6   :  { %s395_s7 = smov 128   ;;  %s396_s8 = smov 8  }
  0xe7   :  { %267 = dma.vmem_to_hbm [thread:$0]  %s262_s2, 2048, %s530_s3, [#allocation3], %s395_s7, %s395_s7, %s396_s8  }
  0xe8   :  { %392 = dma.done.wait [#allocation3], 2048  }
  0xe9   :  { %393 = vsyncadd [#allocation3], 4294965248 }
  0xea   :  { %271 = vsyncpa [#allocation3], 1 }

// kernel: attention_pallas.3
= control target key start
LH: loop header
LB: loop body
LE: loop exit
PB: predicated region body
PF: predicated region fallthrough
CT: control target
= control target key end

     0   :  { %8 = vsyncpa [#allocation3], 0  ;;  %s633_s0 = inlined_call_operand.hbm [shape: f32[128,64], index: 0, kind: input, shape index: {}]   ;;  %s634_s1 = inlined_call_operand.hbm [shape: f32[64,192], index: 1, kind: input, shape index: {}]   ;;  %s635_s2 = inlined_call_operand.vmem [shape: f32[1,192], index: 2, kind: input, shape index: {}]   ;;  %s636_s3 = inlined_call_operand.vmem [shape: f32[128,192], index: 3, kind: output, shape index: {}]  }
   0x1   :  { %9 = vsyncpa [#allocation5], 0  ;;  %s417_s12 = smov [#allocation2]  }
   0x2   :  { %s15_s13 = sshll.u32 %s417_s12, 4  ;;  %s16_s13 = int_to_ptr.vmem [resolvable:$true] %s15_s13 }
   0x3   :  { %s381_s14 = scalar_lea.vmem %s16_s13, 2048  ;;  %p386_p1 = scmp.lt.s32.totalorder %s16_s13, %s16_s13 }
   0x4   :  { %p382_p0 = scmp.ne.s32.totalorder %s16_s13, %s381_s14  ;;  %p387_p2 = scmp.lt.s32.totalorder %s381_s14, %s381_s14 }
   0x6   :  { %p388_p3 = por %p387_p2, %p386_p1 }
   0x8   :  { %p389_p4 = pnand %p388_p3, %p382_p0 }
   0xa   :  { %392 = shalt.err (!%p389_p4)
}
   0xb   :  { %s418_s15 = smov 128   ;;  %s419_s16 = smov 8  }
   0xc   :  { %21 = dma.hbm_to_vmem [thread:$0]  %s633_s0, 2048, %s16_s13, [#allocation3], %s418_s15, %s418_s15, %s419_s16  }
   0xd   :  { %s420_s19 = smov [#allocation4]  }
   0xe   :  { %s27_s20 = sshll.u32 %s420_s19, 4  ;;  %s28_s20 = int_to_ptr.vmem [resolvable:$true] %s27_s20 }
   0xf   :  { %s401_s21 = scalar_lea.vmem %s28_s20, 2048  ;;  %p406_p6 = scmp.lt.s32.totalorder %s28_s20, %s28_s20 }
  0x10   :  { %p402_p5 = scmp.ne.s32.totalorder %s28_s20, %s401_s21  ;;  %p407_p7 = scmp.lt.s32.totalorder %s401_s21, %s401_s21 }
  0x12   :  { %p408_p8 = por %p407_p7, %p406_p6 }
  0x14   :  { %p409_p9 = pnand %p408_p8, %p402_p5 }
  0x16   :  { %412 = shalt.err (!%p409_p9)
}
  0x17   :  { %s421_s22 = smov 256   ;;  %s422_s23 = smov 16  }
  0x18   :  { %33 = dma.hbm_to_vmem [thread:$0]  %s634_s1, 2048, %s28_s20, [#allocation5], %s421_s22, %s421_s22, %s422_s23  }
  0x19   :  { %413 = dma.done.wait [#allocation3], 2048  }
  0x1a   :  { %414 = vsyncadd [#allocation3], 4294965248 }
  0x1b   :  { %415 = dma.done.wait [#allocation5], 2048  }
  0x1c   :  { %416 = vsyncadd [#allocation5], 4294965248  ;;  %v423_v0 = vmov 0.0   ;;  %v73_v1 = vld [vmem:[#allocation4 + $0x78] sm:$0xff]  ;;  %v72_v2 = vld [vmem:[#allocation4 + $0x70] sm:$0xff]  ;;  %vm86_vm0 = vcmask 523264   ;;  %v76_v33 = vlaneseq }
  0x1d   :  { %199 = vmatprep.mubr.f32.mxu0 %v423_v0  ;;  %247 = vmatprep.mubr.f32.mxu1 %v423_v0  ;;  %v71_v3 = vld [vmem:[#allocation4 + $0x68] sm:$0xff]  ;;  %v70_v4 = vld [vmem:[#allocation4 + $0x60] sm:$0xff]  ;;  %v69_v5 = vld [vmem:[#allocation4 + $0x58] sm:$0xff] }
  0x1e   :  { %151 = vmatprep.subr.mxu0 %v73_v1  ;;  %350 = vmatprep.subr.mxu1 %v73_v1  ;;  %v68_v6 = vld [vmem:[#allocation4 + $0x50] sm:$0xff]  ;;  %v67_v7 = vld [vmem:[#allocation4 + $0x48] sm:$0xff]  ;;  %v66_v8 = vld [vmem:[#allocation4 + $0x40] sm:$0xff]  ;;  %v77_v34 = vshrl.u32 %v76_v33, 7 }
  0x1f   :  { %152 = vmatpush1.msra.mxu0 %v72_v2  ;;  %358 = vmatpush1.msra.mxu1 %v72_v2  ;;  %v65_v9 = vld [vmem:[#allocation4 + $0x38] sm:$0xff]  ;;  %v64_v10 = vld [vmem:[#allocation4 + $0x30] sm:$0xff]  ;;  %v63_v11 = vld [vmem:[#allocation4 + $0x28] sm:$0xff] }
  0x20   :  { %153 = vmatprep.subr.mxu0 %v71_v3  ;;  %351 = vmatprep.subr.mxu1 %v71_v3  ;;  %v62_v12 = vld [vmem:[#allocation4 + $0x20] sm:$0xff]  ;;  %v61_v13 = vld [vmem:[#allocation4 + $0x18] sm:$0xff]  ;;  %v60_v14 = vld [vmem:[#allocation4 + $0x10] sm:$0xff]  ;;  %v78_v35 = vsub.s32 0, %v77_v34  ;;  %v82_v37 = vsub.s32 1, %v77_v34 }
  0x21   :  { %154 = vmatpush1.msra.mxu0 %v70_v4  ;;  %359 = vmatpush1.msra.mxu1 %v70_v4  ;;  %v59_v15 = vld [vmem:[#allocation4 + $0x8] sm:$0xff]  ;;  %v58_v16 = vld [vmem:[#allocation4] sm:$0xff]  ;;  %v44_v21 = vld [vmem:[#allocation2 + $0x10] sm:$0xff] }
  0x22   :  { %155 = vmatprep.subr.mxu0 %v69_v5  ;;  %352 = vmatprep.subr.mxu1 %v69_v5  ;;  %v42_v17 = vld [vmem:[#allocation2] sm:$0xff]  ;;  %v43_v19 = vld [vmem:[#allocation2 + $0x8] sm:$0xff]  ;;  %v52_v22 = vld [vmem:[#allocation2 + $0x50] sm:$0xff] }
  0x23   :  { %156 = vmatpush1.msra.mxu0 %v68_v6  ;;  %360 = vmatpush1.msra.mxu1 %v68_v6  ;;  %v50_v18 = vld [vmem:[#allocation2 + $0x40] sm:$0xff]  ;;  %v51_v20 = vld [vmem:[#allocation2 + $0x48] sm:$0xff]  ;;  %v45_v23 = vld [vmem:[#allocation2 + $0x18] sm:$0xff] }
  0x24   :  { %157 = vmatprep.subr.mxu0 %v67_v7  ;;  %353 = vmatprep.subr.mxu1 %v67_v7  ;;  %v53_v24 = vld [vmem:[#allocation2 + $0x58] sm:$0xff]  ;;  %v46_v25 = vld [vmem:[#allocation2 + $0x20] sm:$0xff]  ;;  %v47_v27 = vld [vmem:[#allocation2 + $0x28] sm:$0xff] }
  0x25   :  { %158 = vmatpush1.msra.mxu0 %v66_v8  ;;  %361 = vmatpush1.msra.mxu1 %v66_v8  ;;  %v54_v26 = vld [vmem:[#allocation2 + $0x60] sm:$0xff]  ;;  %v55_v28 = vld [vmem:[#allocation2 + $0x68] sm:$0xff]  ;;  %v48_v29 = vld [vmem:[#allocation2 + $0x30] sm:$0xff] }
  0x26   :  { %159 = vmatprep.subr.mxu0 %v65_v9  ;;  %354 = vmatprep.subr.mxu1 %v65_v9  ;;  %v56_v30 = vld [vmem:[#allocation2 + $0x70] sm:$0xff]  ;;  %v49_v31 = vld [vmem:[#allocation2 + $0x38] sm:$0xff]  ;;  %v74_v36 = vld [vmem:[%s635_s2] sm:$0x3] }
  0x27   :  { %160 = vmatpush1.msra.mxu0 %v64_v10  ;;  %362 = vmatpush1.msra.mxu1 %v64_v10  ;;  %v57_v32 = vld [vmem:[#allocation2 + $0x78] sm:$0xff]  ;;  %v485_v38 = vrot.slane %v74_v36, %v78_v35  ;;  %v487_v39 = vrot.slane %v74_v36, %v82_v37 }
  0x28   :  { %161 = vmatprep.subr.mxu0 %v63_v11  ;;  %355 = vmatprep.subr.mxu1 %v63_v11 }
  0x29   :  { %162 = vmatpush1.msra.mxu0 %v62_v12  ;;  %363 = vmatpush1.msra.mxu1 %v62_v12 }
  0x2a   :  { %163 = vmatprep.subr.mxu0 %v61_v13  ;;  %356 = vmatprep.subr.mxu1 %v61_v13 }
  0x2b   :  { %164 = vmatpush1.msra.mxu0 %v60_v14  ;;  %364 = vmatpush1.msra.mxu1 %v60_v14 }
  0x2c   :  { %165 = vmatprep.subr.mxu0 %v59_v15  ;;  %357 = vmatprep.subr.mxu1 %v59_v15 }
  0x2d   :  { %166 = vmatpush1.msra.mxu0 %v58_v16  ;;  %365 = vmatpush1.msra.mxu1 %v58_v16 }
  0x2e   :  { %334 = vmatmul.mubr.msk.f32.vlgmr.msra.gmra.mxu0 %vm86_vm0, %v42_v17  ;;  %342 = vmatmul.mubr.msk.f32.vlgmr.msra.gmra.mxu1 %vm86_vm0, %v50_v18 }
  0x2f   :  { %205 = vmatprep.mubr.f32.mxu0 %v423_v0  ;;  %253 = vmatprep.mubr.f32.mxu1 %v423_v0 }
  0x32   :  { %335 = vmatmul.mubr.msk.f32.gmra.mxu0 %vm86_vm0, %v43_v19  ;;  %343 = vmatmul.mubr.msk.f32.gmra.mxu1 %vm86_vm0, %v51_v20 }
  0x33   :  { %211 = vmatprep.mubr.f32.mxu0 %v423_v0  ;;  %259 = vmatprep.mubr.f32.mxu1 %v423_v0 }
  0x36   :  { %336 = vmatmul.mubr.msk.f32.gmra.mxu0 %vm86_vm0, %v44_v21  ;;  %344 = vmatmul.mubr.msk.f32.gmra.mxu1 %vm86_vm0, %v52_v22 }
  0x37   :  { %217 = vmatprep.mubr.f32.mxu0 %v423_v0  ;;  %265 = vmatprep.mubr.f32.mxu1 %v423_v0 }
  0x3a   :  { %337 = vmatmul.mubr.msk.f32.gmra.mxu0 %vm86_vm0, %v45_v23  ;;  %345 = vmatmul.mubr.msk.f32.gmra.mxu1 %vm86_vm0, %v53_v24 }
  0x3b   :  { %223 = vmatprep.mubr.f32.mxu0 %v423_v0  ;;  %271 = vmatprep.mubr.f32.mxu1 %v423_v0 }
  0x3e   :  { %338 = vmatmul.mubr.msk.f32.gmra.mxu0 %vm86_vm0, %v46_v25  ;;  %346 = vmatmul.mubr.msk.f32.gmra.mxu1 %vm86_vm0, %v54_v26 }
  0x3f   :  { %229 = vmatprep.mubr.f32.mxu0 %v423_v0  ;;  %277 = vmatprep.mubr.f32.mxu1 %v423_v0 }
  0x42   :  { %339 = vmatmul.mubr.msk.f32.gmra.mxu0 %vm86_vm0, %v47_v27  ;;  %347 = vmatmul.mubr.msk.f32.gmra.mxu1 %vm86_vm0, %v55_v28 }
  0x43   :  { %235 = vmatprep.mubr.f32.mxu0 %v423_v0  ;;  %283 = vmatprep.mubr.f32.mxu1 %v423_v0 }
  0x46   :  { %340 = vmatmul.mubr.msk.f32.gmra.mxu0 %vm86_vm0, %v48_v29  ;;  %348 = vmatmul.mubr.msk.f32.gmra.mxu1 %vm86_vm0, %v56_v30 }
  0x47   :  { %241 = vmatprep.mubr.f32.mxu0 %v423_v0  ;;  %289 = vmatprep.mubr.f32.mxu1 %v423_v0 }
  0x4a   :  { %341 = vmatmul.mubr.msk.f32.gmra.mxu0 %vm86_vm0, %v49_v31  ;;  %349 = vmatmul.mubr.msk.f32.gmra.mxu1 %vm86_vm0, %v57_v32 }
  0xee   :  { %v201_v40 = vpop.f32.mrf.mxu0  ;;  %v249_v41 = vpop.f32.mrf.mxu1 }
  0xef   :  { %v202_v42 = vadd.f32 %v201_v40, %v485_v38  ;;  %v250_v43 = vadd.f32 %v249_v41, %v485_v38 }
  0xf0   :  { %v203_v44 = vpop.f32.mrf.mxu0  ;;  %v251_v45 = vpop.f32.mrf.mxu1 }
  0xf1   :  { %296 = vst [vmem:[%s636_s3] sm:$0xff] %v202_v42  ;;  %312 = vst [vmem:[%s636_s3 + $0x80] sm:$0xff] %v250_v43  ;;  %v204_v46 = vadd.f32 %v203_v44, %v487_v39  ;;  %v252_v47 = vadd.f32 %v251_v45, %v487_v39 }
  0xf2   :  { %v207_v48 = vpop.f32.mrf.mxu0  ;;  %v255_v49 = vpop.f32.mrf.mxu1 }
  0xf3   :  { %297 = vst.msk [vmem:[%s636_s3 + $0x8] sm:$0xff] %vm86_vm0, %v204_v46  ;;  %313 = vst.msk [vmem:[%s636_s3 + $0x88] sm:$0xff] %vm86_vm0, %v252_v47  ;;  %v208_v50 = vadd.f32 %v207_v48, %v485_v38  ;;  %v256_v51 = vadd.f32 %v255_v49, %v485_v38 }
  0xf4   :  { %v209_v52 = vpop.f32.mrf.mxu0  ;;  %v257_v53 = vpop.f32.mrf.mxu1 }
  0xf5   :  { %298 = vst [vmem:[%s636_s3 + $0x10] sm:$0xff] %v208_v50  ;;  %314 = vst [vmem:[%s636_s3 + $0x90] sm:$0xff] %v256_v51  ;;  %v210_v54 = vadd.f32 %v209_v52, %v487_v39  ;;  %v258_v55 = vadd.f32 %v257_v53, %v487_v39 }
  0xf6   :  { %v213_v56 = vpop.f32.mrf.mxu0  ;;  %v261_v57 = vpop.f32.mrf.mxu1 }
  0xf7   :  { %299 = vst.msk [vmem:[%s636_s3 + $0x18] sm:$0xff] %vm86_vm0, %v210_v54  ;;  %315 = vst.msk [vmem:[%s636_s3 + $0x98] sm:$0xff] %vm86_vm0, %v258_v55  ;;  %v214_v58 = vadd.f32 %v213_v56, %v485_v38  ;;  %v262_v59 = vadd.f32 %v261_v57, %v485_v38 }
  0xf8   :  { %v215_v60 = vpop.f32.mrf.mxu0  ;;  %v263_v61 = vpop.f32.mrf.mxu1 }
  0xf9   :  { %300 = vst [vmem:[%s636_s3 + $0x20] sm:$0xff] %v214_v58  ;;  %316 = vst [vmem:[%s636_s3 + $0xa0] sm:$0xff] %v262_v59  ;;  %v216_v62 = vadd.f32 %v215_v60, %v487_v39  ;;  %v264_v63 = vadd.f32 %v263_v61, %v487_v39 }
  0xfa   :  { %v219_v0 = vpop.f32.mrf.mxu0  ;;  %v267_v1 = vpop.f32.mrf.mxu1 }
  0xfb   :  { %301 = vst.msk [vmem:[%s636_s3 + $0x28] sm:$0xff] %vm86_vm0, %v216_v62  ;;  %317 = vst.msk [vmem:[%s636_s3 + $0xa8] sm:$0xff] %vm86_vm0, %v264_v63  ;;  %v220_v2 = vadd.f32 %v219_v0, %v485_v38  ;;  %v268_v3 = vadd.f32 %v267_v1, %v485_v38 }
  0xfc   :  { %v221_v4 = vpop.f32.mrf.mxu0  ;;  %v269_v5 = vpop.f32.mrf.mxu1 }
  0xfd   :  { %302 = vst [vmem:[%s636_s3 + $0x30] sm:$0xff] %v220_v2  ;;  %318 = vst [vmem:[%s636_s3 + $0xb0] sm:$0xff] %v268_v3  ;;  %v222_v6 = vadd.f32 %v221_v4, %v487_v39  ;;  %v270_v7 = vadd.f32 %v269_v5, %v487_v39 }
  0xfe   :  { %v225_v8 = vpop.f32.mrf.mxu0  ;;  %v273_v9 = vpop.f32.mrf.mxu1 }
  0xff   :  { %303 = vst.msk [vmem:[%s636_s3 + $0x38] sm:$0xff] %vm86_vm0, %v222_v6  ;;  %319 = vst.msk [vmem:[%s636_s3 + $0xb8] sm:$0xff] %vm86_vm0, %v270_v7  ;;  %v226_v10 = vadd.f32 %v225_v8, %v485_v38  ;;  %v274_v11 = vadd.f32 %v273_v9, %v485_v38 }
 0x100   :  { %v227_v12 = vpop.f32.mrf.mxu0  ;;  %v275_v13 = vpop.f32.mrf.mxu1 }
 0x101   :  { %304 = vst [vmem:[%s636_s3 + $0x40] sm:$0xff] %v226_v10  ;;  %320 = vst [vmem:[%s636_s3 + $0xc0] sm:$0xff] %v274_v11  ;;  %v228_v14 = vadd.f32 %v227_v12, %v487_v39  ;;  %v276_v15 = vadd.f32 %v275_v13, %v487_v39 }
 0x102   :  { %v231_v16 = vpop.f32.mrf.mxu0  ;;  %v279_v17 = vpop.f32.mrf.mxu1 }
 0x103   :  { %305 = vst.msk [vmem:[%s636_s3 + $0x48] sm:$0xff] %vm86_vm0, %v228_v14  ;;  %321 = vst.msk [vmem:[%s636_s3 + $0xc8] sm:$0xff] %vm86_vm0, %v276_v15  ;;  %v232_v18 = vadd.f32 %v231_v16, %v485_v38  ;;  %v280_v19 = vadd.f32 %v279_v17, %v485_v38 }
 0x104   :  { %v233_v20 = vpop.f32.mrf.mxu0  ;;  %v281_v21 = vpop.f32.mrf.mxu1 }
 0x105   :  { %306 = vst [vmem:[%s636_s3 + $0x50] sm:$0xff] %v232_v18  ;;  %322 = vst [vmem:[%s636_s3 + $0xd0] sm:$0xff] %v280_v19  ;;  %v234_v22 = vadd.f32 %v233_v20, %v487_v39  ;;  %v282_v23 = vadd.f32 %v281_v21, %v487_v39 }
 0x106   :  { %v237_v24 = vpop.f32.mrf.mxu0  ;;  %v285_v25 = vpop.f32.mrf.mxu1 }
 0x107   :  { %307 = vst.msk [vmem:[%s636_s3 + $0x58] sm:$0xff] %vm86_vm0, %v234_v22  ;;  %323 = vst.msk [vmem:[%s636_s3 + $0xd8] sm:$0xff] %vm86_vm0, %v282_v23  ;;  %v238_v26 = vadd.f32 %v237_v24, %v485_v38  ;;  %v286_v27 = vadd.f32 %v285_v25, %v485_v38 }
 0x108   :  { %v239_v28 = vpop.f32.mrf.mxu0  ;;  %v287_v29 = vpop.f32.mrf.mxu1 }
 0x109   :  { %308 = vst [vmem:[%s636_s3 + $0x60] sm:$0xff] %v238_v26  ;;  %324 = vst [vmem:[%s636_s3 + $0xe0] sm:$0xff] %v286_v27  ;;  %v240_v30 = vadd.f32 %v239_v28, %v487_v39  ;;  %v288_v31 = vadd.f32 %v287_v29, %v487_v39 }
 0x10a   :  { %v243_v32 = vpop.f32.mrf.mxu0  ;;  %v291_v33 = vpop.f32.mrf.mxu1 }
 0x10b   :  { %309 = vst.msk [vmem:[%s636_s3 + $0x68] sm:$0xff] %vm86_vm0, %v240_v30  ;;  %325 = vst.msk [vmem:[%s636_s3 + $0xe8] sm:$0xff] %vm86_vm0, %v288_v31  ;;  %v244_v34 = vadd.f32 %v243_v32, %v485_v38  ;;  %v292_v35 = vadd.f32 %v291_v33, %v485_v38 }
 0x10c   :  { %v245_v36 = vpop.f32.mrf.mxu0  ;;  %v293_v37 = vpop.f32.mrf.mxu1 }
 0x10d   :  { %310 = vst [vmem:[%s636_s3 + $0x70] sm:$0xff] %v244_v34  ;;  %326 = vst [vmem:[%s636_s3 + $0xf0] sm:$0xff] %v292_v35  ;;  %v246_v40 = vadd.f32 %v245_v36, %v487_v39  ;;  %v294_v41 = vadd.f32 %v293_v37, %v487_v39 }
 0x10f   :  { %311 = vst.msk [vmem:[%s636_s3 + $0x78] sm:$0xff] %vm86_vm0, %v246_v40  ;;  %327 = vst.msk [vmem:[%s636_s3 + $0xf8] sm:$0xff] %vm86_vm0, %v294_v41 }
 0x110   :  { %332 = vsyncpa [#allocation3], 1 }
 0x111   :  { %333 = vsyncpa [#allocation5], 1 }

// kernel: attention_pallas.4
= control target key start
LH: loop header
LB: loop body
LE: loop exit
PB: predicated region body
PF: predicated region fallthrough
CT: control target
= control target key end

     0   :  { %s2717_s6 = smov 0   ;;  %s3448_s0 = inlined_call_operand.vmem [shape: f32[2,64,192], index: 0, kind: input, shape index: {}]   ;;  %s3449_s1 = inlined_call_operand.vmem [shape: f32[2,64,64], index: 1, kind: output, shape index: {}]  }
   0x1 LB: > { %s2088_s7 = sadd.s32 4294967295, %s2698_s6   ;;  %p2092_p0 = scmp.ge.s32.totalorder %s2698_s6, 1  ;;  %s2698_s6 = sphi %s2717_s6, %s11_s6  }
   0x2   : > { %p87_p1 = scmp.lt.s32.totalorder %s2698_s6, 3 }
   0x4   : > { %p88_p2 = pnand %p2092_p0, %p87_p1 }
   0x5   : > { %p107_p3 = scmp.lt.s32.totalorder (!%p88_p2), %s2088_s7, 1  ;;  %s2700_s12 = smov (!%p88_p2), 64  }
   0x6   : > { %91 = sbr.rel (%p88_p2) target bundleno = 2765 (0xacd), region = 24  ;;  %s2701_s13 = smov (!%p88_p2), 48  }
   0x7   : > { %s2702_s14 = smov (!%p88_p2), 112   ;;  %s2703_s15 = smov (!%p88_p2), 32  }
   0x8   : > { %s2704_s16 = smov (!%p88_p2), 96   ;;  %s2705_s17 = smov (!%p88_p2), 16  }
   0x9   : > { %s2706_s18 = smov (!%p88_p2), 80  }
   0xb   : > { %s3451_s7 = smov (!%p107_p3, %s2088_s7), 1  ;;  %vm165_vm0 = vcmask 130048   ;;  %vm311_vm1 = vcmask 523264   ;;  %vm2016_vm2 = vcmask 392192   ;;  %vm2007_vm3 = vcmask 261120  }
   0xc   : > { %s2195_s8 = sshll.u32 %s3451_s7, 7  ;;  %s2196_s19 = sshll.u32 %s3451_s7, 6 }
   0xd   : > { %s2731_s11 = scalar_lea.vmem %s3448_s0, %s2195_s8  ;;  %s3397_s22 = scalar_lea.vmem %s3449_s1, %s2196_s19 }
   0xe   : > { %v2734_v0 = vld [vmem:[%s2731_s11 + $0x70] sm:$0xff]  ;;  %v2742_v2 = vld [vmem:[%s2731_s11 + $0x60] sm:$0xff]  ;;  %v2830_v24 = vld [vmem:[%s2731_s11 + $0x78] sm:$0xff] }
   0xf   : > { %v2737_v1 = vld [vmem:[%s2731_s11 + $0x50] sm:$0xff]  ;;  %163 = vrot.lane.b32.xlu0 %v2734_v0, %s2700_s12  ;;  %v2745_v3 = vld [vmem:[%s2731_s11 + $0x40] sm:$0xff]  ;;  %v2816_v22 = vmul.f32 0.25, %v2742_v2  ;;  %v2821_v23 = vmul.f32 0.25, %v2734_v0  ;;  %v2833_v25 = vld [vmem:[%s2731_s11 + $0x68] sm:$0xff]  ;;  %2353 = vmatprep.subr.mxu1 %v2830_v24 }
  0x10   : > { %159 = vrot.lane.b32.xlu1 %v2737_v1, %s2700_s12  ;;  %v2750_v4 = vld [vmem:[%s2731_s11 + $0x30] sm:$0xff]  ;;  %v2753_v5 = vld [vmem:[%s2731_s11 + $0x20] sm:$0xff]  ;;  %v2806_v20 = vmul.f32 0.25, %v2745_v3  ;;  %v2811_v21 = vmul.f32 0.25, %v2737_v1  ;;  %2354 = vmatpush3.msra.mxu1 %v2830_v24  ;;  %v2838_v26 = vld [vmem:[%s2731_s11 + $0x58] sm:$0xff] }
  0x11   : > { %v2758_v6 = vld [vmem:[%s2731_s11 + $0x10] sm:$0xff]  ;;  %v2761_v7 = vld [vmem:[%s2731_s11] sm:$0xff]  ;;  %v2797_v18 = vmul.f32 0.25, %v2753_v5  ;;  %v2801_v19 = vmul.f32 0.25, %v2750_v4  ;;  %2355 = vmatprep.subr.mxu1 %v2833_v25  ;;  %v2843_v27 = vld [vmem:[%s2731_s11 + $0x48] sm:$0xff] }
  0x12   : > { %v2766_v8 = vmul.f32 0.25, %v2761_v7  ;;  %v2794_v17 = vmul.f32 0.25, %v2758_v6  ;;  %2356 = vmatpush3.msra.mxu1 %v2833_v25  ;;  %v2848_v28 = vld [vmem:[%s2731_s11 + $0x38] sm:$0xff]  ;;  %v2853_v29 = vld [vmem:[%s2731_s11 + $0x28] sm:$0xff] }
  0x13   : > { %161 = vrot.lane.b32.xlu0 %v2742_v2, %s2700_s12  ;;  %2357 = vmatprep.subr.mxu1 %v2838_v26  ;;  %v2858_v30 = vld [vmem:[%s2731_s11 + $0x18] sm:$0xff]  ;;  %v2863_v31 = vld [vmem:[%s2731_s11 + $0x8] sm:$0xff] }
  0x14   : > { %157 = vrot.lane.b32.xlu1 %v2745_v3, %s2700_s12  ;;  %2341 = vmatprep.mubr.msk.f32.mxu0 %vm165_vm0, %v2766_v8 }
  0x15   : > { %2358 = vmatpush3.msra.mxu1 %v2838_v26 }
  0x16   : > { %2359 = vmatprep.subr.mxu1 %v2843_v27 }
  0x17   : > { %155 = vrot.lane.b32.xlu0 %v2750_v4, %s2700_s12  ;;  %2360 = vmatpush3.msra.mxu1 %v2843_v27 }
  0x18   : > { %153 = vrot.lane.b32.xlu1 %v2753_v5, %s2700_s12  ;;  %2361 = vmatprep.subr.mxu1 %v2848_v28 }
  0x19   : > { %2362 = vmatpush3.msra.mxu1 %v2848_v28 }
  0x1a   : > { %2363 = vmatprep.subr.mxu1 %v2853_v29 }
  0x1b   : > { %151 = vrot.lane.b32.xlu0 %v2758_v6, %s2700_s12  ;;  %2364 = vmatpush3.msra.mxu1 %v2853_v29 }
  0x1c   : > { %149 = vrot.lane.b32.xlu1 %v2761_v7, %s2700_s12  ;;  %2365 = vmatprep.subr.mxu1 %v2858_v30 }
  0x1d   : > { %2366 = vmatpush3.msra.mxu1 %v2858_v30 }
  0x1e   : > { %2367 = vmatprep.subr.mxu1 %v2863_v31 }
  0x1f   : > { %597 = vrot.lane.b32.xlu0 %v2742_v2, %s2701_s13  ;;  %2368 = vmatpush3.msra.mxu1 %v2863_v31 }
  0x20   : > { %599 = vrot.lane.b32.xlu1 %v2734_v0, %s2701_s13 }
  0x24   : > { %595 = vrot.lane.b32.xlu1 %v2737_v1, %s2701_s13 }
  0x28   : > { %593 = vrot.lane.b32.xlu1 %v2745_v3, %s2701_s13 }
  0x81   : > { %v164_v9 = vpop.permute.xlu0 %163 }
  0x82   : > { %2325 = vmatprep.subr.msk.mxu0 %vm165_vm0, %v164_v9  ;;  %v160_v10 = vpop.permute.xlu1 %159 }
  0x83   : > { %2326 = vmatpush3.xpose.msk.msra.mxu0 %vm165_vm0, %v164_v9 }
  0x85   : > { %v162_v11 = vpop.permute.xlu0 %161 }
  0x86   : > { %2327 = vmatprep.subr.msk.mxu0 %vm165_vm0, %v162_v11  ;;  %v158_v12 = vpop.permute.xlu1 %157 }
  0x87   : > { %2328 = vmatpush3.xpose.msk.msra.mxu0 %vm165_vm0, %v162_v11 }
  0x88   : > { %2329 = vmatprep.subr.msk.mxu0 %vm165_vm0, %v160_v10 }
  0x89   : > { %v156_v13 = vpop.permute.xlu0 %155 }
  0x8a   : > { %v154_v14 = vpop.permute.xlu1 %153 }
  0x8b   : > { %2330 = vmatpush3.xpose.msk.msra.mxu0 %vm165_vm0, %v160_v10 }
  0x8c   : > { %2331 = vmatprep.subr.msk.mxu0 %vm165_vm0, %v158_v12 }
  0x8d   : > { %v152_v15 = vpop.permute.xlu0 %151 }
  0x8e   : > { %v150_v16 = vpop.permute.xlu1 %149 }
  0x8f   : > { %2332 = vmatpush3.xpose.msk.msra.mxu0 %vm165_vm0, %v158_v12 }
  0x90   : > { %2333 = vmatprep.subr.msk.mxu0 %vm165_vm0, %v156_v13 }
  0x91   : > { %v2889_v51 = vpop.permute.xlu0 %597 }
  0x92   : > { %v2867_v32 = vpop.permute.xlu1 %599 }
  0x93   : > { %2334 = vmatpush3.xpose.msk.msra.mxu0 %vm165_vm0, %v156_v13  ;;  %2381 = vmatprep.subr.msk.mxu1 %vm165_vm0, %v2867_v32 }
  0x94   : > { %2335 = vmatprep.subr.msk.mxu0 %vm165_vm0, %v154_v14 }
  0x96   : > { %v2885_v49 = vpop.permute.xlu1 %595 }
  0x97   : > { %2336 = vmatpush3.xpose.msk.msra.mxu0 %vm165_vm0, %v154_v14 }
  0x98   : > { %2337 = vmatprep.subr.msk.mxu0 %vm165_vm0, %v152_v15 }
  0x9a   : > { %v2887_v50 = vpop.permute.xlu1 %593 }
  0x9b   : > { %2338 = vmatpush3.xpose.msk.msra.mxu0 %vm165_vm0, %v152_v15 }
  0x9c   : > { %2339 = vmatprep.subr.msk.mxu0 %vm165_vm0, %v150_v16 }
  0x9f   : > { %2340 = vmatpush3.xpose.msk.msra.mxu0 %vm165_vm0, %v150_v16 }
  0xa2   : > { %2342 = vmatmul.mubr.msk.f32.vlgmr.msra.gmra.mxu0 %vm165_vm0, %v2794_v17 }
  0xa3   : > { %2344 = vmatprep.mubr.msk.f32.mxu0 %vm165_vm0, %v2797_v18 }
  0xa6   : > { %2345 = vmatmul.mubr.msk.f32.gmra.mxu0 %vm165_vm0, %v2801_v19 }
  0xa7   : > { %2347 = vmatprep.mubr.msk.f32.mxu0 %vm165_vm0, %v2806_v20 }
  0xaa   : > { %2348 = vmatmul.mubr.msk.f32.gmra.mxu0 %vm165_vm0, %v2811_v21 }
  0xab   : > { %2350 = vmatprep.mubr.msk.f32.mxu0 %vm165_vm0, %v2816_v22 }
  0xae   : > { %2351 = vmatmul.mubr.msk.f32.gmra.mxu0 %vm165_vm0, %v2821_v23 }
 0x162   : > { %v2343_v33 = vpop.f32.mrf.mxu0 }
 0x163   : > { %v315_v34 = vsel %vm311_vm1, %v2343_v33, -inf }
 0x164   : > { %316 = vmax.xlane.f32.xlu1 %v315_v34  ;;  %v272_v35 = vpop.f32.mrf.mxu0 }
 0x165   : > { %v312_v36 = vsel %vm311_vm1, %v272_v35, -inf }
 0x166   : > { %313 = vmax.xlane.f32.xlu0 %v312_v36  ;;  %v2346_v37 = vpop.f32.mrf.mxu0 }
 0x167   : > { %v321_v38 = vsel %vm311_vm1, %v2346_v37, -inf }
 0x168   : > { %v282_v39 = vpop.f32.mrf.mxu0 }
 0x169   : > { %v318_v41 = vsel %vm311_vm1, %v282_v39, -inf }
 0x16a   : > { %322 = vmax.xlane.f32.xlu0 %v321_v38  ;;  %v2349_v40 = vpop.f32.mrf.mxu0 }
 0x16b   : > { %v327_v45 = vsel %vm311_vm1, %v2349_v40, -inf }
 0x16c   : > { %v292_v42 = vpop.f32.mrf.mxu0 }
 0x16d   : > { %v324_v43 = vsel %vm311_vm1, %v292_v42, -inf }
 0x16e   : > { %319 = vmax.xlane.f32.xlu0 %v318_v41  ;;  %325 = vmax.xlane.f32.xlu1 %v324_v43  ;;  %v2352_v44 = vpop.f32.mrf.mxu0 }
 0x16f   : > { %v333_v48 = vsel %vm311_vm1, %v2352_v44, -inf }
 0x170   : > { %v302_v46 = vpop.f32.mrf.mxu0 }
 0x171   : > { %v330_v47 = vsel %vm311_vm1, %v302_v46, -inf }
 0x172   : > { %328 = vmax.xlane.f32.xlu0 %v327_v45  ;;  %331 = vmax.xlane.f32.xlu1 %v330_v47 }
 0x176   : > { %334 = vmax.xlane.f32.xlu0 %v333_v48 }
 0x183   : > { %589 = vrot.lane.b32.xlu1 %v2753_v5, %s2701_s13 }
 0x18c   : > { %591 = vrot.lane.b32.xlu0 %v2750_v4, %s2701_s13 }
 0x1ed   : > { %v317_v52 = vpop.xlane.xlu1 %316 }
 0x1ee   : > { %v337_v53 = vsub.f32 %v2343_v33, %v317_v52 }
 0x1ef   : > { %v314_v54 = vpop.xlane.xlu0 %313 }
 0x1f0   : > { %v346_v55 = vmul.f32 1.442695, %v337_v53  ;;  %v336_v56 = vsub.f32 %v272_v35, %v314_v54 }
 0x1f2   : > { %2564 = vpow2.f32 %v346_v55  ;;  %v344_v57 = vmul.f32 1.442695, %v336_v56 }
 0x1f3   : > { %v323_v62 = vpop.xlane.xlu0 %322 }
 0x1f4   : > { %2566 = vpow2.f32 %v344_v57  ;;  %v339_v10 = vsub.f32 %v2346_v37, %v323_v62 }
 0x1f6   : > { %v350_v13 = vmul.f32 1.442695, %v339_v10 }
 0x1f7   : > { %v320_v63 = vpop.xlane.xlu0 %319  ;;  %v326_v11 = vpop.xlane.xlu1 %325 }
 0x1f8   : > { %v338_v12 = vsub.f32 %v282_v39, %v320_v63  ;;  %v340_v33 = vsub.f32 %v292_v42, %v326_v11  ;;  %2568 = vpow2.f32 %v350_v13 }
 0x1fa   : > { %v348_v16 = vmul.f32 1.442695, %v338_v12  ;;  %v352_v38 = vmul.f32 1.442695, %v340_v33 }
 0x1fb   : > { %v329_v9 = vpop.xlane.xlu0 %328  ;;  %v332_v34 = vpop.xlane.xlu1 %331 }
 0x1fc   : > { %v341_v14 = vsub.f32 %v2349_v40, %v329_v9  ;;  %2570 = vpow2.f32 %v348_v16  ;;  %v342_v41 = vsub.f32 %v302_v46, %v332_v34 }
 0x1fe   : > { %v354_v35 = vmul.f32 1.442695, %v341_v14  ;;  %v356_v45 = vmul.f32 1.442695, %v342_v41 }
 0x1ff   : > { %v2891_v58 = vpop.eup %2564  ;;  %v335_v15 = vpop.xlane.xlu0 %334 }
 0x200   : > { %v363_v59 = vsel %vm311_vm1, %v2891_v58, 0.0  ;;  %v343_v36 = vsub.f32 %v2352_v44, %v335_v15  ;;  %2572 = vpow2.f32 %v354_v35  ;;  %v590_v57 = vpop.permute.xlu1 %589 }
 0x201   : > { %v2895_v60 = vpop.eup %2566  ;;  %364 = vadd.xlane.f32.xlu0 %v363_v59  ;;  %2574 = vpow2.f32 %v352_v38 }
 0x202   : > { %v360_v61 = vsel %vm311_vm1, %v2895_v60, 0.0  ;;  %v358_v43 = vmul.f32 1.442695, %v343_v36 }
 0x203   : > { %361 = vadd.xlane.f32.xlu1 %v360_v61  ;;  %v592_v56 = vpop.permute.xlu0 %591 }
 0x204   : > { %2576 = vpow2.f32 %v358_v43 }
 0x205   : > { %2578 = vpow2.f32 %v356_v45  ;;  %v2903_v37 = vpop.eup %2568 }
 0x206   : > { %v369_v40 = vsel %vm311_vm1, %v2903_v37, 0.0 }
 0x209   : > { %v2905_v39 = vpop.eup %2570 }
 0x20a   : > { %v366_v44 = vsel %vm311_vm1, %v2905_v39, 0.0 }
 0x20d   : > { %v2909_v42 = vpop.eup %2572 }
 0x20e   : > { %v2913_v46 = vpop.eup %2574  ;;  %v375_v47 = vsel %vm311_vm1, %v2909_v42, 0.0 }
 0x20f   : > { %v372_v52 = vsel %vm311_vm1, %v2913_v46, 0.0 }
 0x211   : > { %v2917_v48 = vpop.eup %2576 }
 0x212   : > { %v2921_v53 = vpop.eup %2578  ;;  %v381_v54 = vsel %vm311_vm1, %v2917_v48, 0.0 }
 0x213   : > { %v378_v55 = vsel %vm311_vm1, %v2921_v53, 0.0 }
 0x214   : > { %585 = vrot.lane.b32.xlu1 %v2761_v7, %s2701_s13 }
 0x217   : > { %587 = vrot.lane.b32.xlu0 %v2758_v6, %s2701_s13 }
 0x236   : > { %370 = vadd.xlane.f32.xlu0 %v369_v40 }
 0x238   : > { %367 = vadd.xlane.f32.xlu1 %v366_v44 }
 0x23a   : > { %376 = vadd.xlane.f32.xlu0 %v375_v47 }
 0x23c   : > { %373 = vadd.xlane.f32.xlu1 %v372_v52 }
 0x23e   : > { %382 = vadd.xlane.f32.xlu0 %v381_v54 }
 0x240   : > { %379 = vadd.xlane.f32.xlu1 %v378_v55 }
 0x251   : > { %563 = vrot.lane.b32.xlu1 %v2794_v17, %s2702_s14 }
 0x254   : > { %561 = vrot.lane.b32.xlu0 %v2766_v8, %s2702_s14 }
 0x255   : > { %567 = vrot.lane.b32.xlu1 %v2801_v19, %s2702_s14 }
 0x258   : > { %565 = vrot.lane.b32.xlu0 %v2797_v18, %s2702_s14 }
 0x259   : > { %571 = vrot.lane.b32.xlu1 %v2811_v21, %s2702_s14 }
 0x25c   : > { %569 = vrot.lane.b32.xlu0 %v2806_v20, %s2702_s14 }
 0x25d   : > { %575 = vrot.lane.b32.xlu1 %v2821_v23, %s2702_s14 }
 0x260   : > { %573 = vrot.lane.b32.xlu0 %v2816_v22, %s2702_s14 }
 0x261   : > { %848 = vrot.lane.b32.xlu1 %v2830_v24, %s2702_s14 }
 0x264   : > { %846 = vrot.lane.b32.xlu0 %v2833_v25, %s2702_s14 }
 0x265   : > { %844 = vrot.lane.b32.xlu1 %v2838_v26, %s2702_s14 }
 0x268   : > { %840 = vrot.lane.b32.xlu0 %v2848_v28, %s2702_s14 }
 0x269   : > { %842 = vrot.lane.b32.xlu1 %v2843_v27, %s2702_s14 }
 0x26c   : > { %836 = vrot.lane.b32.xlu0 %v2858_v30, %s2702_s14 }
 0x26d   : > { %838 = vrot.lane.b32.xlu1 %v2853_v29, %s2702_s14 }
 0x270   : > { %1057 = vrot.lane.b32.xlu0 %v2734_v0, %s2703_s15 }
 0x271   : > { %834 = vrot.lane.b32.xlu1 %v2863_v31, %s2702_s14 }
 0x275   : > { %1055 = vrot.lane.b32.xlu1 %v2742_v2, %s2703_s15 }
 0x28a   : > { %v365_v59 = vpop.xlane.xlu0 %364 }
 0x28b   : > { %2580 = vrcp.f32 %v365_v59 }
 0x28c   : > { %v362_v61 = vpop.xlane.xlu1 %361 }
 0x28d   : > { %2582 = vrcp.f32 %v362_v61 }
 0x298   : > { %v2581_v62 = vpop.eup %2580 }
 0x299   : > { %v393_v10 = vmul.f32 %v2581_v62, %v2891_v58 }
 0x29a   : > { %v2583_v63 = vpop.eup %2582 }
 0x29b   : > { %v392_v9 = vmul.f32 %v2583_v63, %v2895_v60 }
 0x29d   : > { %2369 = vmatprep.mubr.msk.f32.mxu1 %vm311_vm1, %v392_v9 }
 0x29e   : > { %2370 = vmatmul.mubr.msk.f32.vlgmr.msra.gmra.mxu1 %vm311_vm1, %v393_v10 }
 0x29f   : > { %2382 = vmatpush3.xpose.msk.msra.mxu1 %vm165_vm0, %v2867_v32  ;;  %v588_v32 = vpop.permute.xlu0 %587 }
 0x2a0   : > { %2383 = vmatprep.subr.msk.mxu1 %vm165_vm0, %v2889_v51 }
 0x2a3   : > { %2384 = vmatpush3.xpose.msk.msra.mxu1 %vm165_vm0, %v2889_v51  ;;  %v586_v51 = vpop.permute.xlu1 %585 }
 0x2a4   : > { %2385 = vmatprep.subr.msk.mxu1 %vm165_vm0, %v2885_v49 }
 0x2a7   : > { %2386 = vmatpush3.xpose.msk.msra.mxu1 %vm165_vm0, %v2885_v49 }
 0x2a8   : > { %2387 = vmatprep.subr.msk.mxu1 %vm165_vm0, %v2887_v50 }
 0x2ab   : > { %2388 = vmatpush3.xpose.msk.msra.mxu1 %vm165_vm0, %v2887_v50 }
 0x2ac   : > { %2389 = vmatprep.subr.msk.mxu1 %vm165_vm0, %v592_v56 }
 0x2af   : > { %2390 = vmatpush3.xpose.msk.msra.mxu1 %vm165_vm0, %v592_v56 }
 0x2b0   : > { %2391 = vmatprep.subr.msk.mxu1 %vm165_vm0, %v590_v57 }
 0x2b3   : > { %2392 = vmatpush3.xpose.msk.msra.mxu1 %vm165_vm0, %v590_v57 }
 0x2b4   : > { %2393 = vmatprep.subr.msk.mxu1 %vm165_vm0, %v588_v32 }
 0x2b7   : > { %2394 = vmatpush3.xpose.msk.msra.mxu1 %vm165_vm0, %v588_v32 }
 0x2b8   : > { %2395 = vmatprep.subr.msk.mxu1 %vm165_vm0, %v586_v51 }
 0x2bb   : > { %2396 = vmatpush3.xpose.msk.msra.mxu1 %vm165_vm0, %v586_v51 }
 0x2bf   : > { %v371_v49 = vpop.xlane.xlu0 %370 }
 0x2c0   : > { %2584 = vrcp.f32 %v371_v49 }
 0x2c1   : > { %v368_v50 = vpop.xlane.xlu1 %367 }
 0x2c2   : > { %2586 = vrcp.f32 %v368_v50 }
 0x2c3   : > { %v377_v58 = vpop.xlane.xlu0 %376 }
 0x2c4   : > { %2588 = vrcp.f32 %v377_v58 }
 0x2c5   : > { %v374_v60 = vpop.xlane.xlu1 %373 }
 0x2c6   : > { %2590 = vrcp.f32 %v374_v60 }
 0x2c7   : > { %v383_v11 = vpop.xlane.xlu0 %382 }
 0x2c8   : > { %2592 = vrcp.f32 %v383_v11 }
 0x2c9   : > { %v380_v12 = vpop.xlane.xlu1 %379 }
 0x2ca   : > { %2594 = vrcp.f32 %v380_v12 }
 0x2cb   : > { %v562_v35 = vpop.permute.xlu0 %561 }
 0x2cd   : > { %v2585_v13 = vpop.eup %2584  ;;  %v564_v43 = vpop.permute.xlu1 %563 }
 0x2ce   : > { %v395_v16 = vmul.f32 %v2585_v13, %v2903_v37 }
 0x2cf   : > { %v2587_v14 = vpop.eup %2586  ;;  %v566_v40 = vpop.permute.xlu0 %565 }
 0x2d0   : > { %v394_v15 = vmul.f32 %v2587_v14, %v2905_v39 }
 0x2d1   : > { %v2589_v33 = vpop.eup %2588  ;;  %v568_v44 = vpop.permute.xlu1 %567 }
 0x2d2   : > { %2372 = vmatprep.mubr.msk.f32.mxu1 %vm311_vm1, %v394_v15  ;;  %v397_v38 = vmul.f32 %v2589_v33, %v2909_v42 }
 0x2d3   : > { %v2591_v34 = vpop.eup %2590  ;;  %2373 = vmatmul.mubr.msk.f32.gmra.mxu1 %vm311_vm1, %v395_v16  ;;  %v570_v42 = vpop.permute.xlu0 %569 }
 0x2d4   : > { %v396_v36 = vmul.f32 %v2591_v34, %v2913_v46 }
 0x2d5   : > { %v2593_v41 = vpop.eup %2592  ;;  %v572_v46 = vpop.permute.xlu1 %571 }
 0x2d6   : > { %2375 = vmatprep.mubr.msk.f32.mxu1 %vm311_vm1, %v396_v36  ;;  %v399_v39 = vmul.f32 %v2593_v41, %v2917_v48 }
 0x2d7   : > { %v2595_v45 = vpop.eup %2594  ;;  %2376 = vmatmul.mubr.msk.f32.gmra.mxu1 %vm311_vm1, %v397_v38  ;;  %v574_v47 = vpop.permute.xlu0 %573 }
 0x2d8   : > { %v398_v37 = vmul.f32 %v2595_v45, %v2921_v53 }
 0x2d9   : > { %v576_v48 = vpop.permute.xlu1 %575 }
 0x2da   : > { %2378 = vmatprep.mubr.msk.f32.mxu1 %vm311_vm1, %v398_v37 }
 0x2db   : > { %2379 = vmatmul.mubr.msk.f32.gmra.mxu1 %vm311_vm1, %v399_v39  ;;  %v847_v53 = vpop.permute.xlu0 %846 }
 0x2dc   : > { %2397 = vmatprep.mubr.msk.f32.mxu1 %vm165_vm0, %v562_v35 }
 0x2dd   : > { %v849_v52 = vpop.permute.xlu1 %848 }
 0x2de   : > { %2409 = vmatprep.subr.mxu0 %v849_v52 }
 0x2df   : > { %2398 = vmatmul.mubr.msk.f32.vlgmr.msra.gmra.mxu1 %vm165_vm0, %v564_v43  ;;  %2410 = vmatpush3.msra.mxu0 %v849_v52  ;;  %v841_v55 = vpop.permute.xlu0 %840 }
 0x2e0   : > { %2400 = vmatprep.mubr.msk.f32.mxu1 %vm165_vm0, %v566_v40  ;;  %2411 = vmatprep.subr.mxu0 %v847_v53 }
 0x2e1   : > { %2412 = vmatpush3.msra.mxu0 %v847_v53  ;;  %v845_v54 = vpop.permute.xlu1 %844 }
 0x2e2   : > { %2413 = vmatprep.subr.mxu0 %v845_v54 }
 0x2e3   : > { %2401 = vmatmul.mubr.msk.f32.gmra.mxu1 %vm165_vm0, %v568_v44  ;;  %2414 = vmatpush3.msra.mxu0 %v845_v54  ;;  %v837_v59 = vpop.permute.xlu0 %836 }
 0x2e4   : > { %2403 = vmatprep.mubr.msk.f32.mxu1 %vm165_vm0, %v570_v42 }
 0x2e5   : > { %v843_v56 = vpop.permute.xlu1 %842 }
 0x2e6   : > { %2415 = vmatprep.subr.mxu0 %v843_v56 }
 0x2e7   : > { %2404 = vmatmul.mubr.msk.f32.gmra.mxu1 %vm165_vm0, %v572_v46  ;;  %2416 = vmatpush3.msra.mxu0 %v843_v56  ;;  %v2993_v62 = vpop.permute.xlu0 %1057 }
 0x2e8   : > { %2406 = vmatprep.mubr.msk.f32.mxu1 %vm165_vm0, %v574_v47  ;;  %2417 = vmatprep.subr.mxu0 %v841_v55 }
 0x2e9   : > { %2418 = vmatpush3.msra.mxu0 %v841_v55  ;;  %v839_v57 = vpop.permute.xlu1 %838 }
 0x2ea   : > { %2419 = vmatprep.subr.mxu0 %v839_v57 }
 0x2eb   : > { %2407 = vmatmul.mubr.msk.f32.gmra.mxu1 %vm165_vm0, %v576_v48  ;;  %2420 = vmatpush3.msra.mxu0 %v839_v57 }
 0x2ec   : > { %2421 = vmatprep.subr.mxu0 %v837_v59 }
 0x2ed   : > { %2422 = vmatpush3.msra.mxu0 %v837_v59  ;;  %v835_v61 = vpop.permute.xlu1 %834 }
 0x2ee   : > { %2423 = vmatprep.subr.mxu0 %v835_v61 }
 0x2ef   : > { %2424 = vmatpush3.msra.mxu0 %v835_v61 }
 0x2f0   : > { %2437 = vmatprep.subr.msk.mxu0 %vm165_vm0, %v2993_v62 }
 0x2f1   : > { %v3025_v39 = vpop.permute.xlu1 %1055 }
 0x35e   : > { %v2997_v63 = vpop.f32.mrf.mxu1 }
 0x360   : > { %v2999_v9 = vpop.f32.mrf.mxu1 }
 0x393   : > { %v3001_v10 = vpop.f32.mrf.mxu1 }
 0x395   : > { %v3003_v32 = vpop.f32.mrf.mxu1 }
 0x397   : > { %v3005_v51 = vpop.f32.mrf.mxu1 }
 0x399   : > { %v3007_v49 = vpop.f32.mrf.mxu1 }
 0x39b   : > { %v3009_v50 = vpop.f32.mrf.mxu1 }
 0x39d   : > { %v3011_v58 = vpop.f32.mrf.mxu1 }
 0x39f   : > { %v2399_v60 = vpop.f32.mrf.mxu1 }
 0x3a0   : > { %v741_v11 = vsel %vm311_vm1, %v2399_v60, -inf }
 0x3a1   : > { %742 = vmax.xlane.f32.xlu1 %v741_v11  ;;  %v699_v12 = vpop.f32.mrf.mxu1 }
 0x3a2   : > { %v738_v13 = vsel %vm311_vm1, %v699_v12, -inf }
 0x3a3   : > { %739 = vmax.xlane.f32.xlu0 %v738_v13  ;;  %v2402_v14 = vpop.f32.mrf.mxu1 }
 0x3a4   : > { %v747_v15 = vsel %vm311_vm1, %v2402_v14, -inf }
 0x3a5   : > { %v709_v16 = vpop.f32.mrf.mxu1 }
 0x3a6   : > { %v744_v34 = vsel %vm311_vm1, %v709_v16, -inf }
 0x3a7   : > { %748 = vmax.xlane.f32.xlu0 %v747_v15  ;;  %v2405_v33 = vpop.f32.mrf.mxu1 }
 0x3a8   : > { %v753_v41 = vsel %vm311_vm1, %v2405_v33, -inf }
 0x3a9   : > { %v719_v35 = vpop.f32.mrf.mxu1 }
 0x3aa   : > { %v750_v36 = vsel %vm311_vm1, %v719_v35, -inf }
 0x3ab   : > { %745 = vmax.xlane.f32.xlu0 %v744_v34  ;;  %751 = vmax.xlane.f32.xlu1 %v750_v36  ;;  %v2408_v38 = vpop.f32.mrf.mxu1 }
 0x3ac   : > { %v759_v37 = vsel %vm311_vm1, %v2408_v38, -inf }
 0x3ad   : > { %v729_v43 = vpop.f32.mrf.mxu1 }
 0x3ae   : > { %v756_v45 = vsel %vm311_vm1, %v729_v43, -inf }
 0x3af   : > { %754 = vmax.xlane.f32.xlu0 %v753_v41  ;;  %757 = vmax.xlane.f32.xlu1 %v756_v45 }
 0x3b3   : > { %760 = vmax.xlane.f32.xlu0 %v759_v37 }
 0x3c0   : > { %1051 = vrot.lane.b32.xlu1 %v2745_v3, %s2703_s15 }
 0x3c9   : > { %1053 = vrot.lane.b32.xlu0 %v2737_v1, %s2703_s15 }
 0x42a   : > { %v743_v40 = vpop.xlane.xlu1 %742 }
 0x42b   : > { %v763_v44 = vsub.f32 %v2399_v60, %v743_v40 }
 0x42c   : > { %v740_v42 = vpop.xlane.xlu0 %739 }
 0x42d   : > { %v772_v46 = vmul.f32 1.442695, %v763_v44  ;;  %v762_v47 = vsub.f32 %v699_v12, %v740_v42 }
 0x42f   : > { %2596 = vpow2.f32 %v772_v46  ;;  %v770_v48 = vmul.f32 1.442695, %v762_v47 }
 0x430   : > { %v749_v3 = vpop.xlane.xlu0 %748 }
 0x431   : > { %2598 = vpow2.f32 %v770_v48  ;;  %v765_v61 = vsub.f32 %v2402_v14, %v749_v3 }
 0x433   : > { %v776_v13 = vmul.f32 1.442695, %v765_v61 }
 0x434   : > { %v746_v55 = vpop.xlane.xlu0 %745  ;;  %v752_v56 = vpop.xlane.xlu1 %751 }
 0x435   : > { %v764_v57 = vsub.f32 %v709_v16, %v746_v55  ;;  %v766_v11 = vsub.f32 %v719_v35, %v752_v56 }
 0x437   : > { %v774_v60 = vmul.f32 1.442695, %v764_v57  ;;  %v778_v36 = vmul.f32 1.442695, %v766_v11 }
 0x438   : > { %v755_v59 = vpop.xlane.xlu0 %754  ;;  %v758_v12 = vpop.xlane.xlu1 %757 }
 0x439   : > { %v767_v15 = vsub.f32 %v2405_v33, %v755_v59  ;;  %2600 = vpow2.f32 %v774_v60  ;;  %v768_v41 = vsub.f32 %v729_v43, %v758_v12 }
 0x43a   : > { %2602 = vpow2.f32 %v776_v13 }
 0x43b   : > { %v780_v45 = vmul.f32 1.442695, %v767_v15  ;;  %2604 = vpow2.f32 %v778_v36  ;;  %v782_v37 = vmul.f32 1.442695, %v768_v41 }
 0x43c   : > { %v3027_v52 = vpop.eup %2596  ;;  %v761_v34 = vpop.xlane.xlu0 %760 }
 0x43d   : > { %v789_v53 = vsel %vm311_vm1, %v3027_v52, 0.0  ;;  %2606 = vpow2.f32 %v780_v45 }
 0x43e   : > { %v3031_v54 = vpop.eup %2598  ;;  %790 = vadd.xlane.f32.xlu0 %v789_v53  ;;  %2608 = vpow2.f32 %v782_v37 }
 0x43f   : > { %v786_v1 = vsel %vm311_vm1, %v3031_v54, 0.0 }
 0x440   : > { %787 = vadd.xlane.f32.xlu1 %v786_v1 }
 0x446   : > { %v3039_v16 = vpop.eup %2600 }
 0x447   : > { %v3041_v14 = vpop.eup %2602  ;;  %v792_v33 = vsel %vm311_vm1, %v3039_v16, 0.0 }
 0x448   : > { %v3045_v35 = vpop.eup %2604  ;;  %v795_v43 = vsel %vm311_vm1, %v3041_v14, 0.0 }
 0x449   : > { %v798_v40 = vsel %vm311_vm1, %v3045_v35, 0.0 }
 0x451   : > { %1047 = vrot.lane.b32.xlu1 %v2753_v5, %s2703_s15  ;;  %v769_v5 = vsub.f32 %v2408_v38, %v761_v34  ;;  %v3049_v38 = vpop.eup %2606 }
 0x452   : > { %v3053_v44 = vpop.eup %2608  ;;  %v801_v42 = vsel %vm311_vm1, %v3049_v38, 0.0 }
 0x453   : > { %v804_v47 = vsel %vm311_vm1, %v3053_v44, 0.0 }
 0x454   : > { %1049 = vrot.lane.b32.xlu0 %v2750_v4, %s2703_s15  ;;  %v784_v4 = vmul.f32 1.442695, %v769_v5 }
 0x456   : > { %2610 = vpow2.f32 %v784_v4 }
 0x463   : > { %v3057_v46 = vpop.eup %2610 }
 0x464   : > { %v807_v48 = vsel %vm311_vm1, %v3057_v46, 0.0 }
 0x473   : > { %793 = vadd.xlane.f32.xlu0 %v792_v33 }
 0x475   : > { %796 = vadd.xlane.f32.xlu1 %v795_v43 }
 0x477   : > { %799 = vadd.xlane.f32.xlu0 %v798_v40 }
 0x479   : > { %802 = vadd.xlane.f32.xlu1 %v801_v42 }
 0x47b   : > { %805 = vadd.xlane.f32.xlu0 %v804_v47 }
 0x47d   : > { %808 = vadd.xlane.f32.xlu1 %v807_v48 }
 0x48e   : > { %1043 = vrot.lane.b32.xlu1 %v2761_v7, %s2703_s15  ;;  %v1052_v7 = vpop.permute.xlu1 %1051 }
 0x491   : > { %1045 = vrot.lane.b32.xlu0 %v2758_v6, %s2703_s15  ;;  %v1054_v6 = vpop.permute.xlu0 %1053 }
 0x492   : > { %1021 = vrot.lane.b32.xlu1 %v2794_v17, %s2704_s16 }
 0x495   : > { %1019 = vrot.lane.b32.xlu0 %v2766_v8, %s2704_s16 }
 0x496   : > { %1025 = vrot.lane.b32.xlu1 %v2801_v19, %s2704_s16 }
 0x499   : > { %1023 = vrot.lane.b32.xlu0 %v2797_v18, %s2704_s16 }
 0x49a   : > { %1029 = vrot.lane.b32.xlu1 %v2811_v21, %s2704_s16 }
 0x49d   : > { %1027 = vrot.lane.b32.xlu0 %v2806_v20, %s2704_s16 }
 0x49e   : > { %1033 = vrot.lane.b32.xlu1 %v2821_v23, %s2704_s16 }
 0x4a1   : > { %1031 = vrot.lane.b32.xlu0 %v2816_v22, %s2704_s16 }
 0x4a2   : > { %1306 = vrot.lane.b32.xlu1 %v2830_v24, %s2704_s16 }
 0x4a5   : > { %1304 = vrot.lane.b32.xlu0 %v2833_v25, %s2704_s16 }
 0x4a6   : > { %1302 = vrot.lane.b32.xlu1 %v2838_v26, %s2704_s16 }
 0x4a9   : > { %1298 = vrot.lane.b32.xlu0 %v2848_v28, %s2704_s16 }
 0x4aa   : > { %1300 = vrot.lane.b32.xlu1 %v2843_v27, %s2704_s16 }
 0x4ad   : > { %1294 = vrot.lane.b32.xlu0 %v2858_v30, %s2704_s16 }
 0x4ae   : > { %1296 = vrot.lane.b32.xlu1 %v2853_v29, %s2704_s16 }
 0x4b1   : > { %1515 = vrot.lane.b32.xlu0 %v2734_v0, %s2705_s17 }
 0x4b2   : > { %1292 = vrot.lane.b32.xlu1 %v2863_v31, %s2704_s16 }
 0x4b6   : > { %1513 = vrot.lane.b32.xlu1 %v2742_v2, %s2705_s17 }
 0x4c7   : > { %v791_v8 = vpop.xlane.xlu0 %790 }
 0x4c8   : > { %2612 = vrcp.f32 %v791_v8 }
 0x4c9   : > { %v788_v17 = vpop.xlane.xlu1 %787 }
 0x4ca   : > { %2614 = vrcp.f32 %v788_v17 }
 0x4cb   : > { %v1050_v24 = vpop.permute.xlu0 %1049 }
 0x4cd   : > { %v1048_v25 = vpop.permute.xlu1 %1047 }
 0x4d5   : > { %v2613_v18 = vpop.eup %2612 }
 0x4d6   : > { %v819_v21 = vmul.f32 %v2613_v18, %v3027_v52 }
 0x4d7   : > { %v2615_v19 = vpop.eup %2614 }
 0x4d8   : > { %v818_v20 = vmul.f32 %v2615_v19, %v3031_v54 }
 0x4da   : > { %2425 = vmatprep.mubr.msk.f32.mxu0 %vm311_vm1, %v818_v20 }
 0x4db   : > { %2426 = vmatmul.mubr.msk.f32.vlgmr.msra.gmra.mxu0 %vm311_vm1, %v819_v21 }
 0x4dc   : > { %2438 = vmatpush3.xpose.msk.msra.mxu0 %vm165_vm0, %v2993_v62 }
 0x4dd   : > { %2439 = vmatprep.subr.msk.mxu0 %vm165_vm0, %v3025_v39 }
 0x4e0   : > { %2440 = vmatpush3.xpose.msk.msra.mxu0 %vm165_vm0, %v3025_v39 }
 0x4e1   : > { %2441 = vmatprep.subr.msk.mxu0 %vm165_vm0, %v1054_v6 }
 0x4e4   : > { %2442 = vmatpush3.xpose.msk.msra.mxu0 %vm165_vm0, %v1054_v6 }
 0x4e5   : > { %2443 = vmatprep.subr.msk.mxu0 %vm165_vm0, %v1052_v7 }
 0x4e8   : > { %2444 = vmatpush3.xpose.msk.msra.mxu0 %vm165_vm0, %v1052_v7 }
 0x4e9   : > { %2445 = vmatprep.subr.msk.mxu0 %vm165_vm0, %v1050_v24 }
 0x4ec   : > { %2446 = vmatpush3.xpose.msk.msra.mxu0 %vm165_vm0, %v1050_v24 }
 0x4ed   : > { %2447 = vmatprep.subr.msk.mxu0 %vm165_vm0, %v1048_v25 }
 0x4f0   : > { %2448 = vmatpush3.xpose.msk.msra.mxu0 %vm165_vm0, %v1048_v25 }
 0x4fc   : > { %v794_v26 = vpop.xlane.xlu0 %793 }
 0x4fd   : > { %2616 = vrcp.f32 %v794_v26 }
 0x4fe   : > { %v797_v27 = vpop.xlane.xlu1 %796 }
 0x4ff   : > { %2618 = vrcp.f32 %v797_v27 }
 0x500   : > { %v800_v28 = vpop.xlane.xlu0 %799 }
 0x501   : > { %2620 = vrcp.f32 %v800_v28 }
 0x502   : > { %v803_v29 = vpop.xlane.xlu1 %802 }
 0x503   : > { %2622 = vrcp.f32 %v803_v29 }
 0x504   : > { %v806_v30 = vpop.xlane.xlu0 %805 }
 0x505   : > { %2624 = vrcp.f32 %v806_v30 }
 0x506   : > { %v809_v31 = vpop.xlane.xlu1 %808 }
 0x507   : > { %2626 = vrcp.f32 %v809_v31 }
 0x508   : > { %v1046_v62 = vpop.permute.xlu0 %1045 }
 0x509   : > { %2449 = vmatprep.subr.msk.mxu0 %vm165_vm0, %v1046_v62 }
 0x50a   : > { %v2617_v39 = vpop.eup %2616  ;;  %2450 = vmatpush3.xpose.msk.msra.mxu0 %vm165_vm0, %v1046_v62  ;;  %v1044_v52 = vpop.permute.xlu1 %1043 }
 0x50b   : > { %v820_v53 = vmul.f32 %v2617_v39, %v3039_v16  ;;  %2451 = vmatprep.subr.msk.mxu0 %vm165_vm0, %v1044_v52  ;;  %v3158_v39 = vld [vmem:[%s2731_s11 + $0x40] sm:$0xff] }
 0x50c   : > { %v2619_v54 = vpop.eup %2618  ;;  %v1020_v56 = vpop.permute.xlu0 %1019 }
 0x50d   : > { %2428 = vmatprep.mubr.msk.f32.mxu0 %vm311_vm1, %v820_v53  ;;  %v821_v1 = vmul.f32 %v2619_v54, %v3041_v14 }
 0x50e   : > { %v2621_v3 = vpop.eup %2620  ;;  %2452 = vmatpush3.xpose.msk.msra.mxu0 %vm165_vm0, %v1044_v52  ;;  %v1022_v60 = vpop.permute.xlu1 %1021  ;;  %v3163_v52 = vld [vmem:[%s2731_s11 + $0x50] sm:$0xff] }
 0x50f   : > { %2429 = vmatmul.mubr.msk.f32.gmra.mxu0 %vm311_vm1, %v821_v1  ;;  %v822_v55 = vmul.f32 %v2621_v3, %v3045_v35 }
 0x510   : > { %v2623_v57 = vpop.eup %2622  ;;  %v1024_v15 = vpop.permute.xlu0 %1023 }
 0x511   : > { %2431 = vmatprep.mubr.msk.f32.mxu0 %vm311_vm1, %v822_v55  ;;  %v823_v59 = vmul.f32 %v2623_v57, %v3049_v38 }
 0x512   : > { %v2625_v61 = vpop.eup %2624  ;;  %v1026_v34 = vpop.permute.xlu1 %1025 }
 0x513   : > { %2432 = vmatmul.mubr.msk.f32.gmra.mxu0 %vm311_vm1, %v823_v59  ;;  %v824_v11 = vmul.f32 %v2625_v61, %v3053_v44 }
 0x514   : > { %v2627_v12 = vpop.eup %2626  ;;  %v1028_v36 = vpop.permute.xlu0 %1027 }
 0x515   : > { %2434 = vmatprep.mubr.msk.f32.mxu0 %vm311_vm1, %v824_v11  ;;  %v825_v13 = vmul.f32 %v2627_v12, %v3057_v46  ;;  %v1447_v12 = vld [vmem:[%s2731_s11 + $0x20] sm:$0xff] }
 0x516   : > { %v1030_v41 = vpop.permute.xlu1 %1029 }
 0x517   : > { %2435 = vmatmul.mubr.msk.f32.gmra.mxu0 %vm311_vm1, %v825_v13 }
 0x518   : > { %2453 = vmatprep.mubr.msk.f32.mxu0 %vm165_vm0, %v1020_v56  ;;  %v1032_v45 = vpop.permute.xlu0 %1031 }
 0x51a   : > { %v1034_v5 = vpop.permute.xlu1 %1033 }
 0x51b   : > { %2454 = vmatmul.mubr.msk.f32.vlgmr.msra.gmra.mxu0 %vm165_vm0, %v1022_v60 }
 0x51c   : > { %2456 = vmatprep.mubr.msk.f32.mxu0 %vm165_vm0, %v1024_v15  ;;  %v1305_v4 = vpop.permute.xlu0 %1304  ;;  %v1448_v15 = vld [vmem:[%s2731_s11 + $0x30] sm:$0xff] }
 0x51e   : > { %v1307_v37 = vpop.permute.xlu1 %1306 }
 0x51f   : > { %2457 = vmatmul.mubr.msk.f32.gmra.mxu0 %vm165_vm0, %v1026_v34  ;;  %2465 = vmatprep.subr.mxu1 %v1307_v37 }
 0x520   : > { %2459 = vmatprep.mubr.msk.f32.mxu0 %vm165_vm0, %v1028_v36  ;;  %2466 = vmatpush3.msra.mxu1 %v1307_v37  ;;  %v1299_v0 = vpop.permute.xlu0 %1298 }
 0x521   : > { %2467 = vmatprep.subr.mxu1 %v1305_v4 }
 0x522   : > { %2468 = vmatpush3.msra.mxu1 %v1305_v4  ;;  %v1303_v2 = vpop.permute.xlu1 %1302 }
 0x523   : > { %2460 = vmatmul.mubr.msk.f32.gmra.mxu0 %vm165_vm0, %v1030_v41  ;;  %2469 = vmatprep.subr.mxu1 %v1303_v2 }
 0x524   : > { %2462 = vmatprep.mubr.msk.f32.mxu0 %vm165_vm0, %v1032_v45  ;;  %2470 = vmatpush3.msra.mxu1 %v1303_v2  ;;  %v1295_v33 = vpop.permute.xlu0 %1294 }
 0x526   : > { %v1301_v16 = vpop.permute.xlu1 %1300 }
 0x527   : > { %2463 = vmatmul.mubr.msk.f32.gmra.mxu0 %vm165_vm0, %v1034_v5  ;;  %2471 = vmatprep.subr.mxu1 %v1301_v16 }
 0x528   : > { %2472 = vmatpush3.msra.mxu1 %v1301_v16  ;;  %v3129_v43 = vpop.permute.xlu0 %1515 }
 0x529   : > { %2473 = vmatprep.subr.mxu1 %v1299_v0 }
 0x52a   : > { %2474 = vmatpush3.msra.mxu1 %v1299_v0  ;;  %v1297_v14 = vpop.permute.xlu1 %1296 }
 0x52b   : > { %2475 = vmatprep.subr.mxu1 %v1297_v14 }
 0x52c   : > { %2476 = vmatpush3.msra.mxu1 %v1297_v14 }
 0x52d   : > { %2477 = vmatprep.subr.mxu1 %v1295_v33 }
 0x52e   : > { %2478 = vmatpush3.msra.mxu1 %v1295_v33  ;;  %v1293_v35 = vpop.permute.xlu1 %1292 }
 0x52f   : > { %2479 = vmatprep.subr.mxu1 %v1293_v35 }
 0x530   : > { %2480 = vmatpush3.msra.mxu1 %v1293_v35 }
 0x531   : > { %2493 = vmatprep.subr.msk.mxu1 %vm165_vm0, %v3129_v43 }
 0x532   : > { %v3167_v53 = vpop.permute.xlu1 %1513 }
 0x59b   : > { %v3133_v38 = vpop.f32.mrf.mxu0 }
 0x59d   : > { %v3135_v40 = vpop.f32.mrf.mxu0 }
 0x5cf   : > { %v3137_v44 = vpop.f32.mrf.mxu0 }
 0x5d1   : > { %v3139_v42 = vpop.f32.mrf.mxu0 }
 0x5d3   : > { %v3141_v46 = vpop.f32.mrf.mxu0 }
 0x5d5   : > { %v3143_v47 = vpop.f32.mrf.mxu0 }
 0x5d7   : > { %v3145_v48 = vpop.f32.mrf.mxu0 }
 0x5d9   : > { %v3147_v6 = vpop.f32.mrf.mxu0 }
 0x5db   : > { %v2455_v7 = vpop.f32.mrf.mxu0 }
 0x5dc   : > { %v1199_v8 = vsel %vm311_vm1, %v2455_v7, -inf }
 0x5dd   : > { %1200 = vmax.xlane.f32.xlu1 %v1199_v8  ;;  %v1157_v17 = vpop.f32.mrf.mxu0 }
 0x5de   : > { %v1196_v18 = vsel %vm311_vm1, %v1157_v17, -inf }
 0x5df   : > { %1197 = vmax.xlane.f32.xlu0 %v1196_v18  ;;  %v2458_v19 = vpop.f32.mrf.mxu0 }
 0x5e0   : > { %v1205_v20 = vsel %vm311_vm1, %v2458_v19, -inf }
 0x5e1   : > { %v1167_v21 = vpop.f32.mrf.mxu0 }
 0x5e2   : > { %v1202_v25 = vsel %vm311_vm1, %v1167_v21, -inf }
 0x5e3   : > { %1206 = vmax.xlane.f32.xlu0 %v1205_v20  ;;  %v2461_v24 = vpop.f32.mrf.mxu0 }
 0x5e4   : > { %v1211_v29 = vsel %vm311_vm1, %v2461_v24, -inf }
 0x5e5   : > { %v1177_v26 = vpop.f32.mrf.mxu0 }
 0x5e6   : > { %v1208_v27 = vsel %vm311_vm1, %v1177_v26, -inf }
 0x5e7   : > { %1203 = vmax.xlane.f32.xlu0 %v1202_v25  ;;  %1209 = vmax.xlane.f32.xlu1 %v1208_v27  ;;  %v2464_v28 = vpop.f32.mrf.mxu0 }
 0x5e8   : > { %v1217_v62 = vsel %vm311_vm1, %v2464_v28, -inf }
 0x5e9   : > { %v1187_v30 = vpop.f32.mrf.mxu0 }
 0x5ea   : > { %v1214_v31 = vsel %vm311_vm1, %v1187_v30, -inf }
 0x5eb   : > { %1212 = vmax.xlane.f32.xlu0 %v1211_v29  ;;  %1215 = vmax.xlane.f32.xlu1 %v1214_v31 }
 0x5ef   : > { %1218 = vmax.xlane.f32.xlu0 %v1217_v62 }
 0x5fc   : > { %1509 = vrot.lane.b32.xlu1 %v3158_v39, %s2705_s17 }
 0x605   : > { %1511 = vrot.lane.b32.xlu0 %v3163_v52, %s2705_s17 }
 0x666   : > { %v1201_v54 = vpop.xlane.xlu1 %1200 }
 0x667   : > { %v1221_v1 = vsub.f32 %v2455_v7, %v1201_v54  ;;  %v1445_v54 = vld [vmem:[%s2731_s11] sm:$0xff] }
 0x668   : > { %v1198_v3 = vpop.xlane.xlu0 %1197 }
 0x669   : > { %v1230_v55 = vmul.f32 1.442695, %v1221_v1  ;;  %v1220_v56 = vsub.f32 %v1157_v17, %v1198_v3  ;;  %v1446_v1 = vld [vmem:[%s2731_s11 + $0x10] sm:$0xff] }
 0x66a   : > { %v1462_v3 = vmul.f32 0.25, %v1446_v1 }
 0x66b   : > { %2628 = vpow2.f32 %v1230_v55  ;;  %v1228_v57 = vmul.f32 1.442695, %v1220_v56  ;;  %v1461_v55 = vmul.f32 0.25, %v1445_v54  ;;  %v1464_v56 = vmul.f32 0.25, %v1448_v15 }
 0x66c   : > { %v1207_v13 = vpop.xlane.xlu0 %1206 }
 0x66d   : > { %2630 = vpow2.f32 %v1228_v57  ;;  %v1223_v5 = vsub.f32 %v2458_v19, %v1207_v13  ;;  %v1463_v57 = vmul.f32 0.25, %v1447_v12 }
 0x66f   : > { %v1234_v0 = vmul.f32 1.442695, %v1223_v5 }
 0x670   : > { %v1204_v34 = vpop.xlane.xlu0 %1203  ;;  %v1210_v36 = vpop.xlane.xlu1 %1209 }
 0x671   : > { %v1222_v41 = vsub.f32 %v1167_v21, %v1204_v34  ;;  %v1224_v4 = vsub.f32 %v1177_v26, %v1210_v36 }
 0x673   : > { %v1232_v37 = vmul.f32 1.442695, %v1222_v41  ;;  %v1236_v33 = vmul.f32 1.442695, %v1224_v4 }
 0x674   : > { %v1213_v45 = vpop.xlane.xlu0 %1212  ;;  %v1216_v2 = vpop.xlane.xlu1 %1215 }
 0x675   : > { %v1225_v16 = vsub.f32 %v2461_v24, %v1213_v45  ;;  %2632 = vpow2.f32 %v1232_v37  ;;  %v1226_v35 = vsub.f32 %v1187_v30, %v1216_v2 }
 0x676   : > { %2634 = vpow2.f32 %v1234_v0 }
 0x677   : > { %v1238_v7 = vmul.f32 1.442695, %v1225_v16  ;;  %2636 = vpow2.f32 %v1236_v33  ;;  %v1240_v17 = vmul.f32 1.442695, %v1226_v35 }
 0x678   : > { %v3169_v59 = vpop.eup %2628  ;;  %v1219_v14 = vpop.xlane.xlu0 %1218 }
 0x679   : > { %v1247_v61 = vsel %vm311_vm1, %v3169_v59, 0.0  ;;  %v1227_v8 = vsub.f32 %v2464_v28, %v1219_v14  ;;  %2638 = vpow2.f32 %v1238_v7  ;;  %v1510_v13 = vpop.permute.xlu1 %1509 }
 0x67a   : > { %v3173_v60 = vpop.eup %2630  ;;  %1248 = vadd.xlane.f32.xlu0 %v1247_v61  ;;  %2640 = vpow2.f32 %v1240_v17  ;;  %v1466_v61 = vmul.f32 0.25, %v3163_v52 }
 0x67b   : > { %v1244_v11 = vsel %vm311_vm1, %v3173_v60, 0.0  ;;  %v1242_v18 = vmul.f32 1.442695, %v1227_v8 }
 0x67c   : > { %1245 = vadd.xlane.f32.xlu1 %v1244_v11  ;;  %v1465_v11 = vmul.f32 0.25, %v3158_v39 }
 0x67d   : > { %2642 = vpow2.f32 %v1242_v18 }
 0x682   : > { %v3181_v20 = vpop.eup %2632 }
 0x683   : > { %v3183_v19 = vpop.eup %2634  ;;  %v1250_v21 = vsel %vm311_vm1, %v3181_v20, 0.0 }
 0x684   : > { %v3187_v24 = vpop.eup %2636  ;;  %v1253_v25 = vsel %vm311_vm1, %v3183_v19, 0.0 }
 0x685   : > { %v1256_v27 = vsel %vm311_vm1, %v3187_v24, 0.0 }
 0x686   : > { %v3191_v26 = vpop.eup %2638 }
 0x687   : > { %v3195_v28 = vpop.eup %2640  ;;  %v1259_v29 = vsel %vm311_vm1, %v3191_v26, 0.0 }
 0x688   : > { %v1262_v31 = vsel %vm311_vm1, %v3195_v28, 0.0 }
 0x68a   : > { %v3199_v30 = vpop.eup %2642 }
 0x68b   : > { %v1265_v62 = vsel %vm311_vm1, %v3199_v30, 0.0 }
 0x68d   : > { %1505 = vrot.lane.b32.xlu1 %v1447_v12, %s2705_s17  ;;  %v1512_v12 = vpop.permute.xlu0 %1511 }
 0x690   : > { %1507 = vrot.lane.b32.xlu0 %v1448_v15, %s2705_s17 }
 0x6af   : > { %1251 = vadd.xlane.f32.xlu0 %v1250_v21 }
 0x6b1   : > { %1254 = vadd.xlane.f32.xlu1 %v1253_v25 }
 0x6b3   : > { %1257 = vadd.xlane.f32.xlu0 %v1256_v27 }
 0x6b5   : > { %1260 = vadd.xlane.f32.xlu1 %v1259_v29 }
 0x6b7   : > { %1263 = vadd.xlane.f32.xlu0 %v1262_v31 }
 0x6b9   : > { %1266 = vadd.xlane.f32.xlu1 %v1265_v62 }
 0x6ca   : > { %1501 = vrot.lane.b32.xlu1 %v1445_v54, %s2705_s17 }
 0x6cd   : > { %1503 = vrot.lane.b32.xlu0 %v1446_v1, %s2705_s17 }
 0x6ce   : > { %1479 = vrot.lane.b32.xlu1 %v1462_v3, %s2706_s18 }
 0x6d1   : > { %1477 = vrot.lane.b32.xlu0 %v1461_v55, %s2706_s18 }
 0x6d2   : > { %1483 = vrot.lane.b32.xlu1 %v1464_v56, %s2706_s18 }
 0x6d5   : > { %1481 = vrot.lane.b32.xlu0 %v1463_v57, %s2706_s18 }
 0x6d6   : > { %1487 = vrot.lane.b32.xlu1 %v1466_v61, %s2706_s18 }
 0x6d9   : > { %1485 = vrot.lane.b32.xlu0 %v1465_v11, %s2706_s18 }
 0x6da   : > { %1491 = vrot.lane.b32.xlu1 %v2821_v23, %s2706_s18 }
 0x6dd   : > { %1489 = vrot.lane.b32.xlu0 %v2816_v22, %s2706_s18 }
 0x703   : > { %v1249_v15 = vpop.xlane.xlu0 %1248 }
 0x704   : > { %2644 = vrcp.f32 %v1249_v15 }
 0x705   : > { %v1246_v52 = vpop.xlane.xlu1 %1245 }
 0x706   : > { %2646 = vrcp.f32 %v1246_v52 }
 0x707   : > { %v1508_v22 = vpop.permute.xlu0 %1507 }
 0x709   : > { %v1506_v23 = vpop.permute.xlu1 %1505 }
 0x711   : > { %v2645_v34 = vpop.eup %2644 }
 0x712   : > { %v1277_v41 = vmul.f32 %v2645_v34, %v3169_v59 }
 0x713   : > { %v2647_v39 = vpop.eup %2646 }
 0x714   : > { %v1276_v36 = vmul.f32 %v2647_v39, %v3173_v60 }
 0x716   : > { %2481 = vmatprep.mubr.msk.f32.mxu1 %vm311_vm1, %v1276_v36 }
 0x717   : > { %2482 = vmatmul.mubr.msk.f32.vlgmr.msra.gmra.mxu1 %vm311_vm1, %v1277_v41 }
 0x718   : > { %2494 = vmatpush3.xpose.msk.msra.mxu1 %vm165_vm0, %v3129_v43 }
 0x719   : > { %2495 = vmatprep.subr.msk.mxu1 %vm165_vm0, %v3167_v53 }
 0x71c   : > { %2496 = vmatpush3.xpose.msk.msra.mxu1 %vm165_vm0, %v3167_v53 }
 0x71d   : > { %2497 = vmatprep.subr.msk.mxu1 %vm165_vm0, %v1512_v12 }
 0x720   : > { %2498 = vmatpush3.xpose.msk.msra.mxu1 %vm165_vm0, %v1512_v12 }
 0x721   : > { %2499 = vmatprep.subr.msk.mxu1 %vm165_vm0, %v1510_v13 }
 0x724   : > { %2500 = vmatpush3.xpose.msk.msra.mxu1 %vm165_vm0, %v1510_v13 }
 0x725   : > { %2501 = vmatprep.subr.msk.mxu1 %vm165_vm0, %v1508_v22 }
 0x728   : > { %2502 = vmatpush3.xpose.msk.msra.mxu1 %vm165_vm0, %v1508_v22 }
 0x729   : > { %2503 = vmatprep.subr.msk.mxu1 %vm165_vm0, %v1506_v23 }
 0x72c   : > { %2504 = vmatpush3.xpose.msk.msra.mxu1 %vm165_vm0, %v1506_v23 }
 0x738   : > { %v1252_v43 = vpop.xlane.xlu0 %1251 }
 0x739   : > { %2648 = vrcp.f32 %v1252_v43 }
 0x73a   : > { %v1255_v53 = vpop.xlane.xlu1 %1254 }
 0x73b   : > { %2650 = vrcp.f32 %v1255_v53 }
 0x73c   : > { %v1258_v59 = vpop.xlane.xlu0 %1257 }
 0x73d   : > { %2652 = vrcp.f32 %v1258_v59  ;;  %v1460_v59 = vld [vmem:[%s2731_s11 + $0x78] sm:$0xff] }
 0x73e   : > { %v1261_v60 = vpop.xlane.xlu1 %1260 }
 0x73f   : > { %2654 = vrcp.f32 %v1261_v60  ;;  %v1458_v60 = vld [vmem:[%s2731_s11 + $0x58] sm:$0xff] }
 0x740   : > { %v1264_v45 = vpop.xlane.xlu0 %1263 }
 0x741   : > { %2656 = vrcp.f32 %v1264_v45  ;;  %v1459_v45 = vld [vmem:[%s2731_s11 + $0x68] sm:$0xff] }
 0x742   : > { %v1267_v5 = vpop.xlane.xlu1 %1266 }
 0x743   : > { %2658 = vrcp.f32 %v1267_v5  ;;  %v1456_v5 = vld [vmem:[%s2731_s11 + $0x38] sm:$0xff] }
 0x744   : > { %v1504_v37 = vpop.permute.xlu0 %1503 }
 0x745   : > { %2505 = vmatprep.subr.msk.mxu1 %vm165_vm0, %v1504_v37 }
 0x746   : > { %v2649_v4 = vpop.eup %2648  ;;  %2506 = vmatpush3.xpose.msk.msra.mxu1 %vm165_vm0, %v1504_v37  ;;  %v1502_v2 = vpop.permute.xlu1 %1501 }
 0x747   : > { %v1278_v0 = vmul.f32 %v2649_v4, %v3181_v20  ;;  %2507 = vmatprep.subr.msk.mxu1 %vm165_vm0, %v1502_v2 }
 0x748   : > { %v2651_v16 = vpop.eup %2650  ;;  %v1478_v17 = vpop.permute.xlu0 %1477 }
 0x749   : > { %2484 = vmatprep.mubr.msk.f32.mxu1 %vm311_vm1, %v1278_v0  ;;  %v1279_v14 = vmul.f32 %v2651_v16, %v3183_v19  ;;  %v1455_v0 = vld [vmem:[%s2731_s11 + $0x28] sm:$0xff] }
 0x74a   : > { %v2653_v33 = vpop.eup %2652  ;;  %2508 = vmatpush3.xpose.msk.msra.mxu1 %vm165_vm0, %v1502_v2  ;;  %v1480_v19 = vpop.permute.xlu1 %1479  ;;  %v1457_v2 = vld [vmem:[%s2731_s11 + $0x48] sm:$0xff] }
 0x74b   : > { %2485 = vmatmul.mubr.msk.f32.gmra.mxu1 %vm311_vm1, %v1279_v14  ;;  %v1280_v35 = vmul.f32 %v2653_v33, %v3187_v24 }
 0x74c   : > { %v2655_v7 = vpop.eup %2654  ;;  %v1482_v24 = vpop.permute.xlu0 %1481 }
 0x74d   : > { %2487 = vmatprep.mubr.msk.f32.mxu1 %vm311_vm1, %v1280_v35  ;;  %v1281_v8 = vmul.f32 %v2655_v7, %v3191_v26 }
 0x74e   : > { %v2657_v18 = vpop.eup %2656  ;;  %v1484_v27 = vpop.permute.xlu1 %1483 }
 0x74f   : > { %2488 = vmatmul.mubr.msk.f32.gmra.mxu1 %vm311_vm1, %v1281_v8  ;;  %v1282_v20 = vmul.f32 %v2657_v18, %v3195_v28 }
 0x750   : > { %v2659_v21 = vpop.eup %2658  ;;  %v1486_v26 = vpop.permute.xlu0 %1485 }
 0x751   : > { %2490 = vmatprep.mubr.msk.f32.mxu1 %vm311_vm1, %v1282_v20  ;;  %v1283_v25 = vmul.f32 %v2659_v21, %v3199_v30 }
 0x752   : > { %v1488_v28 = vpop.permute.xlu1 %1487 }
 0x753   : > { %2491 = vmatmul.mubr.msk.f32.gmra.mxu1 %vm311_vm1, %v1283_v25 }
 0x754   : > { %2509 = vmatprep.mubr.msk.f32.mxu1 %vm165_vm0, %v1478_v17  ;;  %v1490_v29 = vpop.permute.xlu0 %1489 }
 0x756   : > { %v1492_v30 = vpop.permute.xlu1 %1491 }
 0x757   : > { %2510 = vmatmul.mubr.msk.f32.vlgmr.msra.gmra.mxu1 %vm165_vm0, %v1480_v19 }
 0x758   : > { %2512 = vmatprep.mubr.msk.f32.mxu1 %vm165_vm0, %v1482_v24 }
 0x75b   : > { %2513 = vmatmul.mubr.msk.f32.gmra.mxu1 %vm165_vm0, %v1484_v27 }
 0x75c   : > { %2515 = vmatprep.mubr.msk.f32.mxu1 %vm165_vm0, %v1486_v26 }
 0x75f   : > { %2516 = vmatmul.mubr.msk.f32.gmra.mxu1 %vm165_vm0, %v1488_v28 }
 0x760   : > { %2518 = vmatprep.mubr.msk.f32.mxu1 %vm165_vm0, %v1490_v29 }
 0x763   : > { %2519 = vmatmul.mubr.msk.f32.gmra.mxu1 %vm165_vm0, %v1492_v30 }
 0x7d7   : > { %v3263_v31 = vpop.f32.mrf.mxu1 }
 0x7d9   : > { %v3265_v62 = vpop.f32.mrf.mxu1 }
 0x80b   : > { %v3267_v54 = vpop.f32.mrf.mxu1 }
 0x80d   : > { %v3269_v1 = vpop.f32.mrf.mxu1 }
 0x80f   : > { %v3271_v3 = vpop.f32.mrf.mxu1 }
 0x811   : > { %v3273_v55 = vpop.f32.mrf.mxu1 }
 0x813   : > { %v3275_v56 = vpop.f32.mrf.mxu1 }
 0x815   : > { %v3277_v57 = vpop.f32.mrf.mxu1 }
 0x817   : > { %v2511_v61 = vpop.f32.mrf.mxu1 }
 0x818   : > { %v1657_v11 = vsel %vm311_vm1, %v2511_v61, -inf }
 0x819   : > { %1658 = vmax.xlane.f32.xlu1 %v1657_v11  ;;  %v1615_v12 = vpop.f32.mrf.mxu1 }
 0x81a   : > { %v1654_v13 = vsel %vm311_vm1, %v1615_v12, -inf }
 0x81b   : > { %1655 = vmax.xlane.f32.xlu0 %v1654_v13  ;;  %v2514_v15 = vpop.f32.mrf.mxu1 }
 0x81c   : > { %v1663_v41 = vsel %vm311_vm1, %v2514_v15, -inf }
 0x81d   : > { %v1625_v52 = vpop.f32.mrf.mxu1 }
 0x81e   : > { %v1660_v34 = vsel %vm311_vm1, %v1625_v52, -inf }
 0x81f   : > { %1661 = vmax.xlane.f32.xlu0 %v1660_v34  ;;  %v2517_v39 = vpop.f32.mrf.mxu1 }
 0x820   : > { %v1669_v43 = vsel %vm311_vm1, %v2517_v39, -inf }
 0x821   : > { %v1635_v36 = vpop.f32.mrf.mxu1 }
 0x822   : > { %v1666_v22 = vsel %vm311_vm1, %v1635_v36, -inf }
 0x823   : > { %1664 = vmax.xlane.f32.xlu0 %v1663_v41  ;;  %1667 = vmax.xlane.f32.xlu1 %v1666_v22  ;;  %v2520_v23 = vpop.f32.mrf.mxu1 }
 0x824   : > { %v1675_v53 = vsel %vm311_vm1, %v2520_v23, -inf }
 0x825   : > { %v3294_v37 = vpop.f32.mrf.mxu1 }
 0x826   : > { %v1672_v4 = vsel %vm311_vm1, %v3294_v37, -inf }
 0x827   : > { %1670 = vmax.xlane.f32.xlu0 %v1669_v43 }
 0x82b   : > { %1676 = vmax.xlane.f32.xlu0 %v1675_v53 }
 0x834   : > { %1764 = vrot.lane.b32.xlu1 %v1460_v59, %s2706_s18 }
 0x838   : > { %1760 = vrot.lane.b32.xlu1 %v1458_v60, %s2706_s18 }
 0x841   : > { %1762 = vrot.lane.b32.xlu0 %v1459_v45, %s2706_s18 }
 0x845   : > { %1756 = vrot.lane.b32.xlu0 %v1456_v5, %s2706_s18 }
 0x85c   : > { %1673 = vmax.xlane.f32.xlu1 %v1672_v4 }
 0x86d   : > { %1758 = vrot.lane.b32.xlu1 %v1457_v2, %s2706_s18 }
 0x871   : > { %1754 = vrot.lane.b32.xlu1 %v1455_v0, %s2706_s18  ;;  %v1454_v0 = vld [vmem:[%s2731_s11 + $0x18] sm:$0xff] }
 0x8a2   : > { %v1659_v16 = vpop.xlane.xlu1 %1658 }
 0x8a3   : > { %v1679_v14 = vsub.f32 %v2511_v61, %v1659_v16 }
 0x8a4   : > { %v1656_v33 = vpop.xlane.xlu0 %1655 }
 0x8a5   : > { %v1688_v35 = vmul.f32 1.442695, %v1679_v14  ;;  %v1678_v7 = vsub.f32 %v1615_v12, %v1656_v33 }
 0x8a7   : > { %2660 = vpow2.f32 %v1688_v35  ;;  %v1686_v8 = vmul.f32 1.442695, %v1678_v7 }
 0x8a8   : > { %v1662_v17 = vpop.xlane.xlu0 %1661 }
 0x8a9   : > { %2662 = vpow2.f32 %v1686_v8  ;;  %v1680_v18 = vsub.f32 %v1625_v52, %v1662_v17 }
 0x8ab   : > { %v1690_v20 = vmul.f32 1.442695, %v1680_v18 }
 0x8ac   : > { %v1665_v21 = vpop.xlane.xlu0 %1664  ;;  %v1668_v19 = vpop.xlane.xlu1 %1667 }
 0x8ad   : > { %2664 = vpow2.f32 %v1690_v20  ;;  %v1681_v25 = vsub.f32 %v2514_v15, %v1665_v21  ;;  %v1682_v24 = vsub.f32 %v1635_v36, %v1668_v19 }
 0x8af   : > { %v1692_v27 = vmul.f32 1.442695, %v1681_v25  ;;  %v1694_v26 = vmul.f32 1.442695, %v1682_v24 }
 0x8b0   : > { %v1671_v28 = vpop.xlane.xlu0 %1670  ;;  %v1765_v29 = vpop.permute.xlu1 %1764 }
 0x8b1   : > { %2666 = vpow2.f32 %v1692_v27  ;;  %v1683_v30 = vsub.f32 %v2517_v39, %v1671_v28  ;;  %2521 = vmatprep.subr.mxu0 %v1765_v29 }
 0x8b2   : > { %2668 = vpow2.f32 %v1694_v26  ;;  %2522 = vmatpush3.msra.mxu0 %v1765_v29 }
 0x8b3   : > { %v1696_v61 = vmul.f32 1.442695, %v1683_v30 }
 0x8b4   : > { %v3302_v11 = vpop.eup %2660  ;;  %v1677_v12 = vpop.xlane.xlu0 %1676 }
 0x8b5   : > { %2670 = vpow2.f32 %v1696_v61  ;;  %v1685_v13 = vsub.f32 %v2520_v23, %v1677_v12  ;;  %v1705_v52 = vsel %vm311_vm1, %v3302_v11, 0.0  ;;  %v1761_v22 = vpop.permute.xlu1 %1760 }
 0x8b6   : > { %v3306_v15 = vpop.eup %2662  ;;  %1706 = vadd.xlane.f32.xlu0 %v1705_v52 }
 0x8b7   : > { %v1700_v34 = vmul.f32 1.442695, %v1685_v13  ;;  %v1702_v36 = vsel %vm311_vm1, %v3306_v15, 0.0 }
 0x8b8   : > { %v1763_v39 = vpop.permute.xlu0 %1762  ;;  %1703 = vadd.xlane.f32.xlu1 %v1702_v36 }
 0x8b9   : > { %2672 = vpow2.f32 %v1700_v34  ;;  %2523 = vmatprep.subr.mxu0 %v1763_v39 }
 0x8ba   : > { %v3310_v41 = vpop.eup %2664  ;;  %2524 = vmatpush3.msra.mxu0 %v1763_v39 }
 0x8bb   : > { %2525 = vmatprep.subr.mxu0 %v1761_v22  ;;  %v1708_v23 = vsel %vm311_vm1, %v3310_v41, 0.0 }
 0x8bc   : > { %1709 = vadd.xlane.f32.xlu1 %v1708_v23  ;;  %2526 = vmatpush3.msra.mxu0 %v1761_v22  ;;  %v1757_v7 = vpop.permute.xlu0 %1756 }
 0x8be   : > { %v3314_v43 = vpop.eup %2666 }
 0x8bf   : > { %v3316_v53 = vpop.eup %2668  ;;  %v1711_v59 = vsel %vm311_vm1, %v3314_v43, 0.0 }
 0x8c0   : > { %1712 = vadd.xlane.f32.xlu0 %v1711_v59  ;;  %v1714_v60 = vsel %vm311_vm1, %v3316_v53, 0.0 }
 0x8c1   : > { %1715 = vadd.xlane.f32.xlu1 %v1714_v60 }
 0x8c2   : > { %v3322_v45 = vpop.eup %2670 }
 0x8c3   : > { %v1717_v5 = vsel %vm311_vm1, %v3322_v45, 0.0 }
 0x8c4   : > { %1718 = vadd.xlane.f32.xlu0 %v1717_v5 }
 0x8c6   : > { %v3326_v4 = vpop.eup %2672 }
 0x8c7   : > { %v1723_v2 = vsel %vm311_vm1, %v3326_v4, 0.0 }
 0x8c8   : > { %1724 = vadd.xlane.f32.xlu0 %v1723_v2 }
 0x8de   : > { %1752 = vrot.lane.b32.xlu0 %v1454_v0, %s2706_s18 }
 0x8e2   : > { %1911 = vrot.lane.b32.xlu0 %v3135_v40, %s2705_s17 }
 0x8e5   : > { %v1674_v16 = vpop.xlane.xlu1 %1673 }
 0x8e6   : > { %v1684_v14 = vsub.f32 %v3294_v37, %v1674_v16  ;;  %1915 = vrot.lane.b32.xlu0 %v3139_v42, %s2705_s17 }
 0x8e8   : > { %v1698_v33 = vmul.f32 1.442695, %v1684_v14 }
 0x8e9   : > { %v1759_v35 = vpop.permute.xlu1 %1758 }
 0x8ea   : > { %2674 = vpow2.f32 %v1698_v33  ;;  %1919 = vrot.lane.b32.xlu0 %v3143_v47, %s2705_s17  ;;  %2527 = vmatprep.subr.mxu0 %v1759_v35  ;;  %v1453_v47 = vld [vmem:[%s2731_s11 + $0x8] sm:$0xff] }
 0x8eb   : > { %2528 = vmatpush3.msra.mxu0 %v1759_v35 }
 0x8ec   : > { %2529 = vmatprep.subr.mxu0 %v1757_v7 }
 0x8ed   : > { %2530 = vmatpush3.msra.mxu0 %v1757_v7  ;;  %v1755_v8 = vpop.permute.xlu1 %1754 }
 0x8ee   : > { %1923 = vrot.lane.b32.xlu0 %v3147_v6, %s2705_s17  ;;  %2531 = vmatprep.subr.mxu0 %v1755_v8 }
 0x8ef   : > { %2532 = vmatpush3.msra.mxu0 %v1755_v8 }
 0x8f2   : > { %1943 = vrot.lane.b32.xlu0 %v3265_v62, %s2703_s15 }
 0x8f6   : > { %1947 = vrot.lane.b32.xlu0 %v3269_v1, %s2703_s15 }
 0x8f7   : > { %v2675_v40 = vpop.eup %2674 }
 0x8f8   : > { %v1720_v42 = vsel %vm311_vm1, %v2675_v40, 0.0 }
 0x8f9   : > { %1721 = vadd.xlane.f32.xlu1 %v1720_v42 }
 0x8fa   : > { %1951 = vrot.lane.b32.xlu0 %v3273_v55, %s2703_s15 }
 0x8fe   : > { %1955 = vrot.lane.b32.xlu0 %v3277_v57, %s2703_s15 }
 0x90a   : > { %1750 = vrot.lane.b32.xlu1 %v1453_v47, %s2706_s18 }
 0x90e   : > { %1913 = vrot.lane.b32.xlu1 %v3133_v38, %s2705_s17 }
 0x912   : > { %1917 = vrot.lane.b32.xlu1 %v3137_v44, %s2705_s17 }
 0x916   : > { %1921 = vrot.lane.b32.xlu1 %v3141_v46, %s2705_s17 }
 0x91a   : > { %1925 = vrot.lane.b32.xlu1 %v3145_v48, %s2705_s17 }
 0x91e   : > { %1945 = vrot.lane.b32.xlu1 %v3263_v31, %s2703_s15 }
 0x922   : > { %1949 = vrot.lane.b32.xlu1 %v3267_v54, %s2703_s15 }
 0x926   : > { %1953 = vrot.lane.b32.xlu1 %v3271_v3, %s2703_s15 }
 0x92a   : > { %1957 = vrot.lane.b32.xlu1 %v3275_v56, %s2703_s15 }
 0x93f   : > { %v1707_v44 = vpop.xlane.xlu0 %1706 }
 0x941   : > { %v1704_v38 = vpop.xlane.xlu1 %1703 }
 0x942   : > { %2676 = vrcp.f32 %v1704_v38 }
 0x943   : > { %2678 = vrcp.f32 %v1707_v44 }
 0x945   : > { %v1710_v54 = vpop.xlane.xlu1 %1709 }
 0x946   : > { %2680 = vrcp.f32 %v1710_v54 }
 0x949   : > { %v1713_v6 = vpop.xlane.xlu0 %1712 }
 0x94a   : > { %v1716_v3 = vpop.xlane.xlu1 %1715  ;;  %2682 = vrcp.f32 %v1713_v6 }
 0x94b   : > { %2684 = vrcp.f32 %v1716_v3 }
 0x94d   : > { %v1719_v46 = vpop.xlane.xlu0 %1718 }
 0x94e   : > { %2686 = vrcp.f32 %v1719_v46 }
 0x94f   : > { %v2677_v62 = vpop.eup %2676 }
 0x950   : > { %v1734_v48 = vmul.f32 %v2677_v62, %v3306_v15  ;;  %v2679_v56 = vpop.eup %2678 }
 0x951   : > { %v1725_v1 = vpop.xlane.xlu0 %1724  ;;  %v1735_v17 = vmul.f32 %v2679_v56, %v3302_v11 }
 0x952   : > { %2537 = vmatprep.mubr.msk.f32.mxu0 %vm311_vm1, %v1734_v48  ;;  %2688 = vrcp.f32 %v1725_v1 }
 0x953   : > { %v2681_v57 = vpop.eup %2680 }
 0x954   : > { %v1736_v20 = vmul.f32 %v2681_v57, %v3310_v41 }
 0x955   : > { %v1753_v31 = vpop.permute.xlu0 %1752 }
 0x956   : > { %2533 = vmatprep.subr.mxu0 %v1753_v31 }
 0x957   : > { %2534 = vmatpush3.msra.mxu0 %v1753_v31  ;;  %v2683_v18 = vpop.eup %2682 }
 0x958   : > { %v2685_v21 = vpop.eup %2684  ;;  %v1737_v19 = vmul.f32 %v2683_v18, %v3314_v43 }
 0x959   : > { %v1738_v24 = vmul.f32 %v2685_v21, %v3316_v53  ;;  %v1912_v41 = vpop.permute.xlu0 %1911 }
 0x95b   : > { %v2687_v25 = vpop.eup %2686 }
 0x95c   : > { %v1739_v26 = vmul.f32 %v2687_v25, %v3322_v45 }
 0x95d   : > { %v1916_v23 = vpop.permute.xlu0 %1915 }
 0x95f   : > { %v2689_v27 = vpop.eup %2688 }
 0x960   : > { %v1741_v30 = vmul.f32 %v2689_v27, %v3326_v4 }
 0x961   : > { %v1920_v53 = vpop.permute.xlu0 %1919 }
 0x965   : > { %v1924_v60 = vpop.permute.xlu0 %1923 }
 0x969   : > { %v1944_v5 = vpop.permute.xlu0 %1943 }
 0x96d   : > { %v1948_v2 = vpop.permute.xlu0 %1947 }
 0x971   : > { %v1952_v16 = vpop.permute.xlu0 %1951 }
 0x975   : > { %v1956_v33 = vpop.permute.xlu0 %1955 }
 0x982   : > { %v1722_v55 = vpop.xlane.xlu1 %1721 }
 0x983   : > { %2690 = vrcp.f32 %v1722_v55 }
 0x986   : > { %v1751_v37 = vpop.permute.xlu1 %1750 }
 0x987   : > { %2535 = vmatprep.subr.mxu0 %v1751_v37 }
 0x988   : > { %2536 = vmatpush3.msra.mxu0 %v1751_v37 }
 0x989   : > { %2538 = vmatmul.mubr.msk.f32.vlgmr.msra.gmra.mxu0 %vm311_vm1, %v1735_v17 }
 0x98a   : > { %2540 = vmatprep.mubr.msk.f32.mxu0 %vm311_vm1, %v1736_v20  ;;  %v1914_v39 = vpop.permute.xlu1 %1913 }
 0x98b   : > { %v2000_v35 = vsel %vm165_vm0, %v2997_v63, %v1914_v39 }
 0x98d   : > { %2541 = vmatmul.mubr.msk.f32.gmra.mxu0 %vm311_vm1, %v1737_v19 }
 0x98e   : > { %2543 = vmatprep.mubr.msk.f32.mxu0 %vm311_vm1, %v1738_v24  ;;  %v1918_v22 = vpop.permute.xlu1 %1917 }
 0x98f   : > { %v2002_v38 = vsel %vm165_vm0, %v3001_v10, %v1918_v22 }
 0x990   : > { %v2691_v28 = vpop.eup %2690 }
 0x991   : > { %2544 = vmatmul.mubr.msk.f32.gmra.mxu0 %vm311_vm1, %v1739_v26  ;;  %v1740_v29 = vmul.f32 %v2691_v28, %v2675_v40  ;;  %v1999_v40 = vsel %vm165_vm0, %v2999_v9, %v1912_v41  ;;  %v2001_v9 = vsel %vm165_vm0, %v3003_v32, %v1916_v23  ;;  %v2003_v32 = vsel %vm165_vm0, %v3007_v49, %v1920_v53 }
 0x992   : > { %v1922_v43 = vpop.permute.xlu1 %1921  ;;  %v2008_v47 = vsel %vm2007_vm3, %v1999_v40, %v1944_v5  ;;  %v2010_v48 = vsel %vm2007_vm3, %v2001_v9, %v1948_v2  ;;  %v2012_v56 = vsel %vm2007_vm3, %v2003_v32, %v1952_v16  ;;  %v2005_v49 = vsel %vm165_vm0, %v3011_v58, %v1924_v60 }
 0x993   : > { %2546 = vmatprep.mubr.msk.f32.mxu0 %vm311_vm1, %v1740_v29  ;;  %v2004_v10 = vsel %vm165_vm0, %v3005_v51, %v1922_v43  ;;  %v2014_v21 = vsel %vm2007_vm3, %v2005_v49, %v1956_v33 }
 0x995   : > { %2547 = vmatmul.mubr.msk.f32.gmra.mxu0 %vm311_vm1, %v1741_v30 }
 0x996   : > { %v1926_v59 = vpop.permute.xlu1 %1925 }
 0x997   : > { %v2006_v51 = vsel %vm165_vm0, %v3009_v50, %v1926_v59 }
 0x99a   : > { %v1946_v45 = vpop.permute.xlu1 %1945 }
 0x99b   : > { %v2009_v7 = vsel %vm2007_vm3, %v2000_v35, %v1946_v45 }
 0x99e   : > { %v1950_v4 = vpop.permute.xlu1 %1949 }
 0x99f   : > { %v2011_v6 = vsel %vm2007_vm3, %v2002_v38, %v1950_v4 }
 0x9a2   : > { %v1954_v0 = vpop.permute.xlu1 %1953 }
 0x9a3   : > { %v2013_v54 = vsel %vm2007_vm3, %v2004_v10, %v1954_v0 }
 0x9a6   : > { %v1958_v14 = vpop.permute.xlu1 %1957 }
 0x9a7   : > { %v2015_v17 = vsel %vm2007_vm3, %v2006_v51, %v1958_v14 }
 0xa49   : > { %v2539_v61 = vpop.f32.mrf.mxu0 }
 0xa4a   : > { %1977 = vrot.lane.b32.xlu1 %v2539_v61, %s2701_s13 }
 0xa4b   : > { %v1864_v11 = vpop.f32.mrf.mxu0 }
 0xa4c   : > { %1975 = vrot.lane.b32.xlu0 %v1864_v11, %s2701_s13 }
 0xa4d   : > { %v2542_v12 = vpop.f32.mrf.mxu0 }
 0xa4e   : > { %1981 = vrot.lane.b32.xlu1 %v2542_v12, %s2701_s13 }
 0xa4f   : > { %v1874_v13 = vpop.f32.mrf.mxu0 }
 0xa50   : > { %1979 = vrot.lane.b32.xlu0 %v1874_v13, %s2701_s13 }
 0xa51   : > { %v2545_v52 = vpop.f32.mrf.mxu0 }
 0xa52   : > { %1985 = vrot.lane.b32.xlu1 %v2545_v52, %s2701_s13 }
 0xa53   : > { %v1884_v15 = vpop.f32.mrf.mxu0 }
 0xa54   : > { %1983 = vrot.lane.b32.xlu0 %v1884_v15, %s2701_s13 }
 0xa55   : > { %v2548_v34 = vpop.f32.mrf.mxu0 }
 0xa56   : > { %1989 = vrot.lane.b32.xlu1 %v2548_v34, %s2701_s13 }
 0xa57   : > { %v1894_v36 = vpop.f32.mrf.mxu0 }
 0xa58   : > { %1987 = vrot.lane.b32.xlu0 %v1894_v36, %s2701_s13 }
 0xabc   : > { %v1978_v8 = vpop.permute.xlu1 %1977 }
 0xabd   : > { %v2018_v42 = vsel %vm2016_vm2, %v2009_v7, %v1978_v8 }
 0xabe   : > { %2026 = vst.msk [vmem:[%s3397_s22 + $0x8] sm:$0xff] %vm311_vm1, %v2018_v42  ;;  %v1976_v63 = vpop.permute.xlu0 %1975 }
 0xabf   : > { %v2017_v44 = vsel %vm2016_vm2, %v2008_v47, %v1976_v63 }
 0xac0   : > { %2025 = vst.msk [vmem:[%s3397_s22] sm:$0xff] %vm311_vm1, %v2017_v44  ;;  %v1982_v46 = vpop.permute.xlu1 %1981 }
 0xac1   : > { %v2020_v62 = vsel %vm2016_vm2, %v2011_v6, %v1982_v46 }
 0xac2   : > { %2028 = vst.msk [vmem:[%s3397_s22 + $0x18] sm:$0xff] %vm311_vm1, %v2020_v62  ;;  %v1980_v1 = vpop.permute.xlu0 %1979 }
 0xac3   : > { %v2019_v31 = vsel %vm2016_vm2, %v2010_v48, %v1980_v1 }
 0xac4   : > { %2027 = vst.msk [vmem:[%s3397_s22 + $0x10] sm:$0xff] %vm311_vm1, %v2019_v31  ;;  %v1986_v3 = vpop.permute.xlu1 %1985 }
 0xac5   : > { %v2022_v55 = vsel %vm2016_vm2, %v2013_v54, %v1986_v3 }
 0xac6   : > { %2030 = vst.msk [vmem:[%s3397_s22 + $0x28] sm:$0xff] %vm311_vm1, %v2022_v55  ;;  %v1984_v57 = vpop.permute.xlu0 %1983 }
 0xac7   : > { %v2021_v37 = vsel %vm2016_vm2, %v2012_v56, %v1984_v57 }
 0xac8   : > { %2029 = vst.msk [vmem:[%s3397_s22 + $0x20] sm:$0xff] %vm311_vm1, %v2021_v37  ;;  %v1990_v18 = vpop.permute.xlu1 %1989 }
 0xac9   : > { %v2024_v20 = vsel %vm2016_vm2, %v2015_v17, %v1990_v18 }
 0xaca   : > { %2032 = vst.msk [vmem:[%s3397_s22 + $0x38] sm:$0xff] %vm311_vm1, %v2024_v20  ;;  %v1988_v19 = vpop.permute.xlu0 %1987 }
 0xacb   : > { %v2023_v25 = vsel %vm2016_vm2, %v2014_v21, %v1988_v19 }
 0xacc   : > { %2031 = vst.msk [vmem:[%s3397_s22 + $0x30] sm:$0xff] %vm311_vm1, %v2023_v25 }
 0xacd PF: > { %s11_s6 = sadd.s32 1, %s2698_s6  }
 0xace   : > { %p8_p4 = scmp.ge.s32.totalorder %s11_s6, 4  }
 0xad0   :  { %10 = sbr.rel (!%p8_p4) target bundleno = 1 (0x1), region = 54 }

</bundles_post_ra>
